<compile_context>
chip_gen: v7x
topology: tpu7x:2x2x1
jax: 0.10.0
libtpu: 0.0.40
codegen_flags: <defaults>
</compile_context>

<pallas_src>
import numpy as np
import jax
import jax.numpy as jnp
from jax.experimental import pallas as pl
from jax.experimental.pallas import tpu as pltpu

# ----------------------------------------------------------------------------
# Problem sizes (channel_in_out=4, channel_attention=5, frequency_dim=16).
# ----------------------------------------------------------------------------
N = 2        # batch
C = 4        # channel_in_out
CA = 5       # channel_attention
H = 16       # frequency_dim (dim=2 in NCHW)
W = 16       # time dim      (dim=3 in NCHW)
HW = H * W   # lane-dense spatial width (256)


def _compute_thresholds():
    """Replicates the dcomp threshold loop from DTFA.forward exactly."""
    dnum = 300
    gap = 1.0 / dnum
    cnt = 0.0
    th = []
    for i in range(1, dnum):
        cnt = cnt + i * gap
        if cnt < 1:
            th.append(np.float32(cnt))
        else:
            break
    return th


THRESHOLDS = _compute_thresholds()
N_DCOMP = len(THRESHOLDS)   # 23, matches nn.Conv2d(23, in_channels, ...)

# ----------------------------------------------------------------------------
# Packed-parameter slab layout: one VMEM input instead of ~11 tiny DMAs.
# ----------------------------------------------------------------------------
_COL_TH = 0                      # rows 0:23           dcomp thresholds (column)
_COL_WF2 = 1                     # rows 0:C,  23 cols  conv2d_fn_2 weight
_COL_W1 = _COL_WF2 + N_DCOMP     # rows 0:CA, C cols   cov1d_d_1 weight
_COL_B1 = _COL_W1 + C            # rows 0:CA           cov1d_d_1 bias
_COL_W2 = _COL_B1 + 1            # rows 0:C,  CA cols  cov1d_d_2 weight
_COL_B2 = _COL_W2 + CA           # rows 0:C            cov1d_d_2 bias
_COL_WF = _COL_B2 + 1            # rows 0:C            conv2d_fn weight (column)
_COL_BF2 = _COL_WF + 1           # rows 0:C            conv2d_fn_2 bias
_COL_BO = _COL_BF2 + 1           # rows 0:C            out conv bias (BN folded)
_COL_WOX = _COL_BO + 1           # rows 0:C, C cols    out conv weight, x half
_COL_WOA = _COL_WOX + C          # rows 0:C, C cols    out conv weight, att half
_COL_BF = _COL_WOA + C           # row 0               conv2d_fn bias (scalar)
_PM_COLS = _COL_BF + 1
_PM_ROWS = max(N_DCOMP, CA, C)


# ----------------------------------------------------------------------------
# Small helpers (trace-time; only jnp ops).
# ----------------------------------------------------------------------------
def _split_hi_lo(a):
    """f32 -> (bf16-exact high part, small residual).

    Keeps the tiny in-kernel matmuls exact even if the MXU f32 path rounds
    operands to bf16: the 0/1 right-hand operands are exactly representable,
    the high part is exact by construction, and the residual's own rounding
    is O(2^-18) relative.
    """
    hi = a.astype(jnp.bfloat16).astype(jnp.float32)
    return hi, a - hi


def _exact_dot(a, b01):
    a_hi, a_lo = _split_hi_lo(a)
    return (jnp.dot(a_hi, b01, preferred_element_type=jnp.float32)
            + jnp.dot(a_lo, b01, preferred_element_type=jnp.float32))


def _sigmoid_eup(v):
    # sigmoid via tanh: rides the EUP slot, no VALU divide, full accuracy.
    return 0.5 * jnp.tanh(0.5 * v) + 0.5


# ----------------------------------------------------------------------------
# Pallas kernel: full DTFABlock forward for the whole batch in one step.
# ----------------------------------------------------------------------------
def dtfa_block_kernel(x_ref, xf_ref, pm_ref, out_ref):
    n_dim = x_ref.shape[0]

    # ---- unpack the coalesced parameter slab (static slices, tiny) ---------
    pm = pm_ref[...]
    th_col = pm[0:N_DCOMP, _COL_TH:_COL_TH + 1]          # (23, 1)
    wf2 = pm[0:C, _COL_WF2:_COL_WF2 + N_DCOMP]           # (C, 23)
    w1 = pm[0:CA, _COL_W1:_COL_W1 + C]                   # (CA, C)
    b1 = pm[0:CA, _COL_B1:_COL_B1 + 1]                   # (CA, 1)
    w2 = pm[0:C, _COL_W2:_COL_W2 + CA]                   # (C, CA)
    b2 = pm[0:C, _COL_B2:_COL_B2 + 1]                    # (C, 1)
    wf_col = pm[0:C, _COL_WF:_COL_WF + 1]                # (C, 1)
    bf2_col = pm[0:C, _COL_BF2:_COL_BF2 + 1]             # (C, 1)
    bo_col = pm[0:C, _COL_BO:_COL_BO + 1]                # (C, 1)  BN folded
    wo_x = pm[0:C, _COL_WOX:_COL_WOX + C]                # (C, C)  BN folded
    wo_a = pm[0:C, _COL_WOA:_COL_WOA + C]                # (C, C)  BN folded
    bf = pm[0:1, _COL_BF:_COL_BF + 1]                    # (1, 1)

    # ---- 0/1 expansion matrices for the (H,W) -> 256-lane layout -----------
    # rep_mat[h, h*W+w] = 1  (repeat-each-W);  tile_mat[w, h*W+w] = 1 (tile).
    # Built on the VPU from integer iotas (exact in f32), no extra DMAs.
    pos = jax.lax.broadcasted_iota(jnp.int32, (H, HW), 1).astype(jnp.float32)
    row = jax.lax.broadcasted_iota(jnp.int32, (H, HW), 0).astype(jnp.float32)
    hpos = jnp.floor(pos * (1.0 / W))                    # p // W, exact
    rep_mat = jnp.where(hpos == row, 1.0, 0.0)           # (H, HW)
    tile_mat = jnp.where((pos - hpos * W) == row, 1.0, 0.0)   # (W, HW), H == W

    wf2_hi, wf2_lo = _split_hi_lo(wf2)                   # hoisted out of the loop

    def se_chain(z):              # z: (C, L) -> sigmoid(w2 @ relu(w1 @ z + b1) + b2)
        h1 = jnp.dot(w1, z, preferred_element_type=jnp.float32) + b1
        h1 = jnp.maximum(h1, 0.0)
        h2 = jnp.dot(w2, h1, preferred_element_type=jnp.float32) + b2
        return _sigmoid_eup(h2)

    outs = []
    for n in range(n_dim):
        # ---- DTFA squeeze paths (kept in the natural NCHW factored layout) -
        xn = x_ref[n]                                    # (C, H, W)
        zt2 = se_chain(jnp.mean(xn, axis=1))             # (C, W)  time path
        zf2 = se_chain(jnp.mean(xn, axis=2))             # (C, H)  freq path

        # ---- outer product fused with conv2d_fn (C->1), built lane-dense ---
        # s[p=h*W+w] = sum_c wf[c]*zf2[c,h]*zt2[c,w] + bf
        u = _exact_dot(zf2 * wf_col, rep_mat)            # (C, HW): wf[c]*zf2[c, p//W]
        v = _exact_dot(zt2, tile_mat)                    # (C, HW): zt2[c, p%W]
        s = jnp.sum(u * v, axis=0, keepdims=True) + bf   # (1, HW)

        # ---- dcomp thresholds + conv2d_fn_2 (23->C), all thresholds at once
        mask = jnp.where(s > th_col, 1.0, 0.0)           # (23, HW) 0/1 mask
        gates = (jnp.dot(wf2_hi, mask, preferred_element_type=jnp.float32)
                 + jnp.dot(wf2_lo, mask, preferred_element_type=jnp.float32))

        # ---- gate the input features (torch.mul(out, feature_in)) ----------
        xfn = xf_ref[n]                                  # (C, HW) lane-dense x
        att = (s * gates + bf2_col) * xfn                # (C, HW)

        # ---- tail: cat([x, att]) -> 1x1 conv -> BN (folded) -> ReLU --------
        # kept on the VPU (exact f32); 8 dense FMAs on 256-wide slabs.
        acc = jnp.zeros((C, HW), jnp.float32)
        for ci in range(C):
            acc = acc + wo_x[:, ci:ci + 1] * xfn[ci:ci + 1, :]
            acc = acc + wo_a[:, ci:ci + 1] * att[ci:ci + 1, :]
        outs.append(jnp.maximum(acc + bo_col, 0.0))      # (C, HW)

    out_ref[...] = jnp.stack(outs, axis=0)               # one (N, C, HW) store


# ----------------------------------------------------------------------------
# Wrapper
# ----------------------------------------------------------------------------
def _pack_params(p):
    # Fold eval-mode BatchNorm into the output 1x1 conv once, at trace time.
    wo_f = p["bn_scale"][:, None] * p["wo"]              # (C, 2C)
    bo_f = p["bn_scale"] * p["bo"] + p["bn_shift"]       # (C,)
    th = jnp.asarray(THRESHOLDS, dtype=jnp.float32)      # (23,)

    pm = jnp.zeros((_PM_ROWS, _PM_COLS), jnp.float32)
    pm = pm.at[0:N_DCOMP, _COL_TH].set(th)
    pm = pm.at[0:C, _COL_WF2:_COL_WF2 + N_DCOMP].set(p["wf2"])
    pm = pm.at[0:CA, _COL_W1:_COL_W1 + C].set(p["w1"])
    pm = pm.at[0:CA, _COL_B1].set(p["b1"][:, 0])
    pm = pm.at[0:C, _COL_W2:_COL_W2 + CA].set(p["w2"])
    pm = pm.at[0:C, _COL_B2].set(p["b2"][:, 0])
    pm = pm.at[0:C, _COL_WF].set(p["wf"][0])
    pm = pm.at[0:C, _COL_BF2].set(p["bf2"])
    pm = pm.at[0:C, _COL_BO].set(bo_f)
    pm = pm.at[0:C, _COL_WOX:_COL_WOX + C].set(wo_f[:, :C])
    pm = pm.at[0:C, _COL_WOA:_COL_WOA + C].set(wo_f[:, C:])
    pm = pm.at[0, _COL_BF].set(p["bf"][0])
    return pm


def _dtfa_block(x, p):
    n, c, h, w = x.shape
    pm = _pack_params(p)
    x_flat = x.reshape(n, c, h * w)      # free contiguity-preserving reshape

    vmem = pl.BlockSpec(memory_space=pltpu.MemorySpace.VMEM)
    out_flat = pl.pallas_call(
        dtfa_block_kernel,
        out_shape=jax.ShapeDtypeStruct((n, c, h * w), jnp.float32),
        # No grid: the whole problem (~8 KiB) runs as a single kernel step and
        # only 4 DMAs touch HBM (3 in, 1 out).  For batch >~8 on v7x, add a
        # leading grid axis over n with dimension_semantics=("parallel",) to
        # use the second TensorCore; at n=2 the per-step overhead cancels it.
        in_specs=[vmem, vmem, vmem],
        out_specs=vmem,
    )(x, x_flat, pm)
    return out_flat.reshape(n, c, h, w)


dtfa_block = jax.jit(_dtfa_block)


# ----------------------------------------------------------------------------
# Plain-JAX reference (same math, NCHW, unfused BN) for a sanity check.
# ----------------------------------------------------------------------------
def _sigmoid(v):
    return 1.0 / (1.0 + jnp.exp(-v))


def ref_forward(x, p):
    def conv1d_path(z):                              # z: (N, C, L)
        z = jnp.einsum("oc,ncl->nol", p["w1"], z) + p["b1"][None]
        z = jnp.maximum(z, 0.0)
        z = jnp.einsum("oc,ncl->nol", p["w2"], z) + p["b2"][None]
        return _sigmoid(z)

    zt = conv1d_path(jnp.mean(x, axis=2))            # (N, C, W)
    zf = conv1d_path(jnp.mean(x, axis=3))            # (N, C, H)
    outer = zf[:, :, :, None] * zt[:, :, None, :]    # (N, C, H, W)
    s = jnp.einsum("oc,nchw->nohw", p["wf"], outer) + p["bf"][None, :, None, None]
    dcomp = jnp.concatenate(
        [jnp.where(s > t, s, jnp.float32(0.0)) for t in THRESHOLDS], axis=1)
    att = jnp.einsum("oc,nchw->nohw", p["wf2"], dcomp) + p["bf2"][None, :, None, None]
    att = att * x
    cat = jnp.concatenate([x, att], axis=1)
    out = jnp.einsum("oc,nchw->nohw", p["wo"], cat) + p["bo"][None, :, None, None]
    out = out * p["bn_scale"][None, :, None, None] + p["bn_shift"][None, :, None, None]
    return jnp.maximum(out, 0.0)


# ----------------------------------------------------------------------------
# Deterministic parameter init + run
# ----------------------------------------------------------------------------
def make_params(key):
    ks = jax.random.split(key, 12)
    p = {
        "w1": 0.2 * jax.random.normal(ks[0], (CA, C), jnp.float32),
        "b1": 0.1 * jax.random.normal(ks[1], (CA, 1), jnp.float32),
        "w2": 0.2 * jax.random.normal(ks[2], (C, CA), jnp.float32),
        "b2": 0.1 * jax.random.normal(ks[3], (C, 1), jnp.float32),
        "wf": 0.2 * jax.random.normal(ks[4], (1, C), jnp.float32),
        "bf": 0.1 * jax.random.normal(ks[5], (1,), jnp.float32),
        "wf2": 0.2 * jax.random.normal(ks[6], (C, N_DCOMP), jnp.float32),
        "bf2": 0.1 * jax.random.normal(ks[7], (C,), jnp.float32),
        "wo": 0.2 * jax.random.normal(ks[8], (C, 2 * C), jnp.float32),
        "bo": 0.1 * jax.random.normal(ks[9], (C,), jnp.float32),
    }
    gamma = 1.0 + 0.1 * jax.random.normal(ks[10], (C,), jnp.float32)
    beta = 0.1 * jax.random.normal(ks[11], (C,), jnp.float32)
    running_mean = jnp.zeros((C,), jnp.float32)
    running_var = jnp.ones((C,), jnp.float32)
    eps = 1e-5
    scale = gamma / jnp.sqrt(running_var + eps)
    p["bn_scale"] = scale
    p["bn_shift"] = beta - running_mean * scale
    return p


if __name__ == "__main__":
    root = jax.random.PRNGKey(0)
    k_x, k_p = jax.random.split(root)
    x = jax.random.normal(k_x, (N, C, H, W), jnp.float32)
    params = make_params(k_p)

    out = jax.block_until_ready(dtfa_block(x, params))

    ref = ref_forward(x, params)
    assert out.shape == (N, C, H, W)
    err = np.abs(np.asarray(out) - np.asarray(ref))
    # Allow an extremely small fraction of mismatches from float-boundary flips
    # at the strict dcomp thresholds (slightly different FP association than
    # the reference); the bulk must match tightly.
    frac_bad = float(np.mean(err > 1e-3))
    assert frac_bad < 0.01, f"too many mismatches: {frac_bad}, max err {err.max()}"
    assert float(np.median(err)) < 1e-4, f"bulk error too large: {np.median(err)}"
    print("KERNEL_OK")
</pallas_src>

<mosaic_0001>
module attributes {stable_mosaic.version = 11 : i64} {
  func.func @dtfa_block_kernel(%arg0: memref<2x4x16x16xf32, #tpu.memory_space<vmem>>, %arg1: memref<2x4x256xf32, #tpu.memory_space<vmem>>, %arg2: memref<23x47xf32, #tpu.memory_space<vmem>>, %arg3: memref<2x4x256xf32, #tpu.memory_space<vmem>>) attributes {dimension_semantics = [], scalar_prefetch = 0 : i64, scratch_operands = 0 : i64, tpu.core_type = #tpu.core_type<tc>} {
    %c0 = arith.constant 0 : index
    %c0_0 = arith.constant 0 : index
    %0 = vector.load %arg2[%c0, %c0_0] : memref<23x47xf32, #tpu.memory_space<vmem>>, vector<23x47xf32>
    %1 = vector.extract_strided_slice %0 {offsets = [0, 0], sizes = [23, 1], strides = [1, 1]} : vector<23x47xf32> to vector<23x1xf32>
    %2 = vector.extract_strided_slice %0 {offsets = [0, 1], sizes = [4, 23], strides = [1, 1]} : vector<23x47xf32> to vector<4x23xf32>
    %3 = vector.extract_strided_slice %0 {offsets = [0, 24], sizes = [5, 4], strides = [1, 1]} : vector<23x47xf32> to vector<5x4xf32>
    %4 = vector.extract_strided_slice %0 {offsets = [0, 28], sizes = [5, 1], strides = [1, 1]} : vector<23x47xf32> to vector<5x1xf32>
    %5 = vector.extract_strided_slice %0 {offsets = [0, 29], sizes = [4, 5], strides = [1, 1]} : vector<23x47xf32> to vector<4x5xf32>
    %6 = vector.extract_strided_slice %0 {offsets = [0, 34], sizes = [4, 1], strides = [1, 1]} : vector<23x47xf32> to vector<4x1xf32>
    %7 = vector.extract_strided_slice %0 {offsets = [0, 35], sizes = [4, 1], strides = [1, 1]} : vector<23x47xf32> to vector<4x1xf32>
    %8 = vector.extract_strided_slice %0 {offsets = [0, 36], sizes = [4, 1], strides = [1, 1]} : vector<23x47xf32> to vector<4x1xf32>
    %9 = vector.extract_strided_slice %0 {offsets = [0, 37], sizes = [4, 1], strides = [1, 1]} : vector<23x47xf32> to vector<4x1xf32>
    %10 = vector.extract_strided_slice %0 {offsets = [0, 38], sizes = [4, 4], strides = [1, 1]} : vector<23x47xf32> to vector<4x4xf32>
    %11 = vector.extract_strided_slice %0 {offsets = [0, 42], sizes = [4, 4], strides = [1, 1]} : vector<23x47xf32> to vector<4x4xf32>
    %12 = vector.extract_strided_slice %0 {offsets = [0, 46], sizes = [1, 1], strides = [1, 1]} : vector<23x47xf32> to vector<1x1xf32>
    %13 = tpu.iota {dimensions = array<i32: 1>} : vector<16x256xi32>
    %14 = arith.sitofp %13 : vector<16x256xi32> to vector<16x256xf32>
    %15 = tpu.iota {dimensions = array<i32: 0>} : vector<16x256xi32>
    %16 = arith.sitofp %15 : vector<16x256xi32> to vector<16x256xf32>
    %cst = arith.constant 6.250000e-02 : f32
    %17 = vector.broadcast %cst : f32 to vector<16x256xf32>
    %18 = arith.mulf %14, %17 : vector<16x256xf32>
    %19 = math.floor %18 : vector<16x256xf32>
    %20 = arith.cmpf oeq, %19, %16 : vector<16x256xf32>
    %cst_1 = arith.constant 1.000000e+00 : f32
    %cst_2 = arith.constant 0.000000e+00 : f32
    %21 = vector.broadcast %cst_1 : f32 to vector<16x256xf32>
    %22 = vector.broadcast %cst_2 : f32 to vector<16x256xf32>
    %23 = arith.select %20, %21, %22 : vector<16x256xi1>, vector<16x256xf32>
    %cst_3 = arith.constant 1.600000e+01 : f32
    %24 = vector.broadcast %cst_3 : f32 to vector<16x256xf32>
    %25 = arith.mulf %19, %24 : vector<16x256xf32>
    %26 = arith.subf %14, %25 : vector<16x256xf32>
    %27 = arith.cmpf oeq, %26, %16 : vector<16x256xf32>
    %cst_4 = arith.constant 1.000000e+00 : f32
    %cst_5 = arith.constant 0.000000e+00 : f32
    %28 = vector.broadcast %cst_4 : f32 to vector<16x256xf32>
    %29 = vector.broadcast %cst_5 : f32 to vector<16x256xf32>
    %30 = arith.select %27, %28, %29 : vector<16x256xi1>, vector<16x256xf32>
    %31 = arith.truncf %2 : vector<4x23xf32> to vector<4x23xbf16>
    %32 = arith.extf %31 : vector<4x23xbf16> to vector<4x23xf32>
    %33 = arith.subf %2, %32 : vector<4x23xf32>
    %c0_6 = arith.constant 0 : index
    %c0_7 = arith.constant 0 : index
    %c0_8 = arith.constant 0 : index
    %c0_9 = arith.constant 0 : index
    %34 = vector.load %arg0[%c0_6, %c0_7, %c0_8, %c0_9] : memref<2x4x16x16xf32, #tpu.memory_space<vmem>>, vector<1x4x16x16xf32>
    %35 = vector.shape_cast %34 : vector<1x4x16x16xf32> to vector<4x16x16xf32>
    %cst_10 = arith.constant dense<0.000000e+00> : vector<4x16xf32>
    %36 = vector.multi_reduction <add>, %35, %cst_10 [1] : vector<4x16x16xf32> to vector<4x16xf32>
    %cst_11 = arith.constant 1.600000e+01 : f32
    %37 = vector.broadcast %cst_11 : f32 to vector<4x16xf32>
    %38 = arith.divf %36, %37 : vector<4x16xf32>
    %cst_12 = arith.constant dense<0.000000e+00> : vector<5x16xf32>
    %39 = tpu.matmul %3, %38, %cst_12 {dimension_numbers = #tpu.dot_dimension_numbers<[1], [0], [0], [1], [0, 0, 1, 1], [], []>} : vector<5x4xf32>, vector<4x16xf32>, vector<5x16xf32> -> vector<5x16xf32>
    %40 = vector.broadcast %4 : vector<5x1xf32> to vector<5x16xf32>
    %41 = arith.addf %39, %40 : vector<5x16xf32>
    %cst_13 = arith.constant 0.000000e+00 : f32
    %42 = vector.broadcast %cst_13 : f32 to vector<5x16xf32>
    %43 = arith.maximumf %41, %42 : vector<5x16xf32>
    %cst_14 = arith.constant dense<0.000000e+00> : vector<4x16xf32>
    %44 = tpu.matmul %5, %43, %cst_14 {dimension_numbers = #tpu.dot_dimension_numbers<[1], [0], [0], [1], [0, 0, 1, 1], [], []>} : vector<4x5xf32>, vector<5x16xf32>, vector<4x16xf32> -> vector<4x16xf32>
    %45 = vector.broadcast %6 : vector<4x1xf32> to vector<4x16xf32>
    %46 = arith.addf %44, %45 : vector<4x16xf32>
    %cst_15 = arith.constant 5.000000e-01 : f32
    %47 = vector.broadcast %cst_15 : f32 to vector<4x16xf32>
    %48 = arith.mulf %47, %46 : vector<4x16xf32>
    %49 = math.tanh %48 : vector<4x16xf32>
    %cst_16 = arith.constant 5.000000e-01 : f32
    %50 = vector.broadcast %cst_16 : f32 to vector<4x16xf32>
    %51 = arith.mulf %50, %49 : vector<4x16xf32>
    %cst_17 = arith.constant 5.000000e-01 : f32
    %52 = vector.broadcast %cst_17 : f32 to vector<4x16xf32>
    %53 = arith.addf %51, %52 : vector<4x16xf32>
    %cst_18 = arith.constant dense<0.000000e+00> : vector<4x16xf32>
    %54 = vector.multi_reduction <add>, %35, %cst_18 [2] : vector<4x16x16xf32> to vector<4x16xf32>
    %cst_19 = arith.constant 1.600000e+01 : f32
    %55 = vector.broadcast %cst_19 : f32 to vector<4x16xf32>
    %56 = arith.divf %54, %55 : vector<4x16xf32>
    %cst_20 = arith.constant dense<0.000000e+00> : vector<5x16xf32>
    %57 = tpu.matmul %3, %56, %cst_20 {dimension_numbers = #tpu.dot_dimension_numbers<[1], [0], [0], [1], [0, 0, 1, 1], [], []>} : vector<5x4xf32>, vector<4x16xf32>, vector<5x16xf32> -> vector<5x16xf32>
    %58 = vector.broadcast %4 : vector<5x1xf32> to vector<5x16xf32>
    %59 = arith.addf %57, %58 : vector<5x16xf32>
    %cst_21 = arith.constant 0.000000e+00 : f32
    %60 = vector.broadcast %cst_21 : f32 to vector<5x16xf32>
    %61 = arith.maximumf %59, %60 : vector<5x16xf32>
    %cst_22 = arith.constant dense<0.000000e+00> : vector<4x16xf32>
    %62 = tpu.matmul %5, %61, %cst_22 {dimension_numbers = #tpu.dot_dimension_numbers<[1], [0], [0], [1], [0, 0, 1, 1], [], []>} : vector<4x5xf32>, vector<5x16xf32>, vector<4x16xf32> -> vector<4x16xf32>
    %63 = vector.broadcast %6 : vector<4x1xf32> to vector<4x16xf32>
    %64 = arith.addf %62, %63 : vector<4x16xf32>
    %cst_23 = arith.constant 5.000000e-01 : f32
    %65 = vector.broadcast %cst_23 : f32 to vector<4x16xf32>
    %66 = arith.mulf %65, %64 : vector<4x16xf32>
    %67 = math.tanh %66 : vector<4x16xf32>
    %cst_24 = arith.constant 5.000000e-01 : f32
    %68 = vector.broadcast %cst_24 : f32 to vector<4x16xf32>
    %69 = arith.mulf %68, %67 : vector<4x16xf32>
    %cst_25 = arith.constant 5.000000e-01 : f32
    %70 = vector.broadcast %cst_25 : f32 to vector<4x16xf32>
    %71 = arith.addf %69, %70 : vector<4x16xf32>
    %72 = vector.broadcast %7 : vector<4x1xf32> to vector<4x16xf32>
    %73 = arith.mulf %71, %72 : vector<4x16xf32>
    %74 = arith.truncf %73 : vector<4x16xf32> to vector<4x16xbf16>
    %75 = arith.extf %74 : vector<4x16xbf16> to vector<4x16xf32>
    %76 = arith.subf %73, %75 : vector<4x16xf32>
    %cst_26 = arith.constant dense<0.000000e+00> : vector<4x256xf32>
    %77 = tpu.matmul %75, %23, %cst_26 {dimension_numbers = #tpu.dot_dimension_numbers<[1], [0], [0], [1], [0, 0, 1, 1], [], []>} : vector<4x16xf32>, vector<16x256xf32>, vector<4x256xf32> -> vector<4x256xf32>
    %cst_27 = arith.constant dense<0.000000e+00> : vector<4x256xf32>
    %78 = tpu.matmul %76, %23, %cst_27 {dimension_numbers = #tpu.dot_dimension_numbers<[1], [0], [0], [1], [0, 0, 1, 1], [], []>} : vector<4x16xf32>, vector<16x256xf32>, vector<4x256xf32> -> vector<4x256xf32>
    %79 = arith.addf %77, %78 : vector<4x256xf32>
    %80 = arith.truncf %53 : vector<4x16xf32> to vector<4x16xbf16>
    %81 = arith.extf %80 : vector<4x16xbf16> to vector<4x16xf32>
    %82 = arith.subf %53, %81 : vector<4x16xf32>
    %cst_28 = arith.constant dense<0.000000e+00> : vector<4x256xf32>
    %83 = tpu.matmul %81, %30, %cst_28 {dimension_numbers = #tpu.dot_dimension_numbers<[1], [0], [0], [1], [0, 0, 1, 1], [], []>} : vector<4x16xf32>, vector<16x256xf32>, vector<4x256xf32> -> vector<4x256xf32>
    %cst_29 = arith.constant dense<0.000000e+00> : vector<4x256xf32>
    %84 = tpu.matmul %82, %30, %cst_29 {dimension_numbers = #tpu.dot_dimension_numbers<[1], [0], [0], [1], [0, 0, 1, 1], [], []>} : vector<4x16xf32>, vector<16x256xf32>, vector<4x256xf32> -> vector<4x256xf32>
    %85 = arith.addf %83, %84 : vector<4x256xf32>
    %86 = arith.mulf %79, %85 : vector<4x256xf32>
    %cst_30 = arith.constant dense<0.000000e+00> : vector<256xf32>
    %87 = vector.multi_reduction <add>, %86, %cst_30 [0] : vector<4x256xf32> to vector<256xf32>
    %88 = vector.shape_cast %87 : vector<256xf32> to vector<1x256xf32>
    %89 = vector.broadcast %12 : vector<1x1xf32> to vector<1x256xf32>
    %90 = arith.addf %88, %89 : vector<1x256xf32>
    %91 = vector.broadcast %90 : vector<1x256xf32> to vector<23x256xf32>
    %92 = vector.broadcast %1 : vector<23x1xf32> to vector<23x256xf32>
    %93 = arith.cmpf ogt, %91, %92 : vector<23x256xf32>
    %cst_31 = arith.constant 1.000000e+00 : f32
    %cst_32 = arith.constant 0.000000e+00 : f32
    %94 = vector.broadcast %cst_31 : f32 to vector<23x256xf32>
    %95 = vector.broadcast %cst_32 : f32 to vector<23x256xf32>
    %96 = arith.select %93, %94, %95 : vector<23x256xi1>, vector<23x256xf32>
    %cst_33 = arith.constant dense<0.000000e+00> : vector<4x256xf32>
    %97 = tpu.matmul %32, %96, %cst_33 {dimension_numbers = #tpu.dot_dimension_numbers<[1], [0], [0], [1], [0, 0, 1, 1], [], []>} : vector<4x23xf32>, vector<23x256xf32>, vector<4x256xf32> -> vector<4x256xf32>
    %cst_34 = arith.constant dense<0.000000e+00> : vector<4x256xf32>
    %98 = tpu.matmul %33, %96, %cst_34 {dimension_numbers = #tpu.dot_dimension_numbers<[1], [0], [0], [1], [0, 0, 1, 1], [], []>} : vector<4x23xf32>, vector<23x256xf32>, vector<4x256xf32> -> vector<4x256xf32>
    %99 = arith.addf %97, %98 : vector<4x256xf32>
    %c0_35 = arith.constant 0 : index
    %c0_36 = arith.constant 0 : index
    %c0_37 = arith.constant 0 : index
    %100 = vector.load %arg1[%c0_35, %c0_36, %c0_37] : memref<2x4x256xf32, #tpu.memory_space<vmem>>, vector<1x4x256xf32>
    %101 = vector.shape_cast %100 : vector<1x4x256xf32> to vector<4x256xf32>
    %102 = vector.broadcast %90 : vector<1x256xf32> to vector<4x256xf32>
    %103 = arith.mulf %102, %99 : vector<4x256xf32>
    %104 = vector.broadcast %8 : vector<4x1xf32> to vector<4x256xf32>
    %105 = arith.addf %103, %104 : vector<4x256xf32>
    %106 = arith.mulf %105, %101 : vector<4x256xf32>
    %cst_38 = arith.constant 0.000000e+00 : f32
    %107 = vector.broadcast %cst_38 : f32 to vector<4x256xf32>
    %108 = vector.extract_strided_slice %10 {offsets = [0, 0], sizes = [4, 1], strides = [1, 1]} : vector<4x4xf32> to vector<4x1xf32>
    %109 = vector.extract_strided_slice %101 {offsets = [0, 0], sizes = [1, 256], strides = [1, 1]} : vector<4x256xf32> to vector<1x256xf32>
    %110 = vector.broadcast %108 : vector<4x1xf32> to vector<4x256xf32>
    %111 = vector.broadcast %109 : vector<1x256xf32> to vector<4x256xf32>
    %112 = arith.mulf %110, %111 : vector<4x256xf32>
    %113 = arith.addf %107, %112 : vector<4x256xf32>
    %114 = vector.extract_strided_slice %11 {offsets = [0, 0], sizes = [4, 1], strides = [1, 1]} : vector<4x4xf32> to vector<4x1xf32>
    %115 = vector.extract_strided_slice %106 {offsets = [0, 0], sizes = [1, 256], strides = [1, 1]} : vector<4x256xf32> to vector<1x256xf32>
    %116 = vector.broadcast %114 : vector<4x1xf32> to vector<4x256xf32>
    %117 = vector.broadcast %115 : vector<1x256xf32> to vector<4x256xf32>
    %118 = arith.mulf %116, %117 : vector<4x256xf32>
    %119 = arith.addf %113, %118 : vector<4x256xf32>
    %120 = vector.extract_strided_slice %10 {offsets = [0, 1], sizes = [4, 1], strides = [1, 1]} : vector<4x4xf32> to vector<4x1xf32>
    %121 = vector.extract_strided_slice %101 {offsets = [1, 0], sizes = [1, 256], strides = [1, 1]} : vector<4x256xf32> to vector<1x256xf32>
    %122 = vector.broadcast %120 : vector<4x1xf32> to vector<4x256xf32>
    %123 = vector.broadcast %121 : vector<1x256xf32> to vector<4x256xf32>
    %124 = arith.mulf %122, %123 : vector<4x256xf32>
    %125 = arith.addf %119, %124 : vector<4x256xf32>
    %126 = vector.extract_strided_slice %11 {offsets = [0, 1], sizes = [4, 1], strides = [1, 1]} : vector<4x4xf32> to vector<4x1xf32>
    %127 = vector.extract_strided_slice %106 {offsets = [1, 0], sizes = [1, 256], strides = [1, 1]} : vector<4x256xf32> to vector<1x256xf32>
    %128 = vector.broadcast %126 : vector<4x1xf32> to vector<4x256xf32>
    %129 = vector.broadcast %127 : vector<1x256xf32> to vector<4x256xf32>
    %130 = arith.mulf %128, %129 : vector<4x256xf32>
    %131 = arith.addf %125, %130 : vector<4x256xf32>
    %132 = vector.extract_strided_slice %10 {offsets = [0, 2], sizes = [4, 1], strides = [1, 1]} : vector<4x4xf32> to vector<4x1xf32>
    %133 = vector.extract_strided_slice %101 {offsets = [2, 0], sizes = [1, 256], strides = [1, 1]} : vector<4x256xf32> to vector<1x256xf32>
    %134 = vector.broadcast %132 : vector<4x1xf32> to vector<4x256xf32>
    %135 = vector.broadcast %133 : vector<1x256xf32> to vector<4x256xf32>
    %136 = arith.mulf %134, %135 : vector<4x256xf32>
    %137 = arith.addf %131, %136 : vector<4x256xf32>
    %138 = vector.extract_strided_slice %11 {offsets = [0, 2], sizes = [4, 1], strides = [1, 1]} : vector<4x4xf32> to vector<4x1xf32>
    %139 = vector.extract_strided_slice %106 {offsets = [2, 0], sizes = [1, 256], strides = [1, 1]} : vector<4x256xf32> to vector<1x256xf32>
    %140 = vector.broadcast %138 : vector<4x1xf32> to vector<4x256xf32>
    %141 = vector.broadcast %139 : vector<1x256xf32> to vector<4x256xf32>
    %142 = arith.mulf %140, %141 : vector<4x256xf32>
    %143 = arith.addf %137, %142 : vector<4x256xf32>
    %144 = vector.extract_strided_slice %10 {offsets = [0, 3], sizes = [4, 1], strides = [1, 1]} : vector<4x4xf32> to vector<4x1xf32>
    %145 = vector.extract_strided_slice %101 {offsets = [3, 0], sizes = [1, 256], strides = [1, 1]} : vector<4x256xf32> to vector<1x256xf32>
    %146 = vector.broadcast %144 : vector<4x1xf32> to vector<4x256xf32>
    %147 = vector.broadcast %145 : vector<1x256xf32> to vector<4x256xf32>
    %148 = arith.mulf %146, %147 : vector<4x256xf32>
    %149 = arith.addf %143, %148 : vector<4x256xf32>
    %150 = vector.extract_strided_slice %11 {offsets = [0, 3], sizes = [4, 1], strides = [1, 1]} : vector<4x4xf32> to vector<4x1xf32>
    %151 = vector.extract_strided_slice %106 {offsets = [3, 0], sizes = [1, 256], strides = [1, 1]} : vector<4x256xf32> to vector<1x256xf32>
    %152 = vector.broadcast %150 : vector<4x1xf32> to vector<4x256xf32>
    %153 = vector.broadcast %151 : vector<1x256xf32> to vector<4x256xf32>
    %154 = arith.mulf %152, %153 : vector<4x256xf32>
    %155 = arith.addf %149, %154 : vector<4x256xf32>
    %156 = vector.broadcast %9 : vector<4x1xf32> to vector<4x256xf32>
    %157 = arith.addf %155, %156 : vector<4x256xf32>
    %cst_39 = arith.constant 0.000000e+00 : f32
    %158 = vector.broadcast %cst_39 : f32 to vector<4x256xf32>
    %159 = arith.maximumf %157, %158 : vector<4x256xf32>
    %c1 = arith.constant 1 : index
    %c0_40 = arith.constant 0 : index
    %c0_41 = arith.constant 0 : index
    %c0_42 = arith.constant 0 : index
    %160 = vector.load %arg0[%c1, %c0_40, %c0_41, %c0_42] : memref<2x4x16x16xf32, #tpu.memory_space<vmem>>, vector<1x4x16x16xf32>
    %161 = vector.shape_cast %160 : vector<1x4x16x16xf32> to vector<4x16x16xf32>
    %cst_43 = arith.constant dense<0.000000e+00> : vector<4x16xf32>
    %162 = vector.multi_reduction <add>, %161, %cst_43 [1] : vector<4x16x16xf32> to vector<4x16xf32>
    %cst_44 = arith.constant 1.600000e+01 : f32
    %163 = vector.broadcast %cst_44 : f32 to vector<4x16xf32>
    %164 = arith.divf %162, %163 : vector<4x16xf32>
    %cst_45 = arith.constant dense<0.000000e+00> : vector<5x16xf32>
    %165 = tpu.matmul %3, %164, %cst_45 {dimension_numbers = #tpu.dot_dimension_numbers<[1], [0], [0], [1], [0, 0, 1, 1], [], []>} : vector<5x4xf32>, vector<4x16xf32>, vector<5x16xf32> -> vector<5x16xf32>
    %166 = vector.broadcast %4 : vector<5x1xf32> to vector<5x16xf32>
    %167 = arith.addf %165, %166 : vector<5x16xf32>
    %cst_46 = arith.constant 0.000000e+00 : f32
    %168 = vector.broadcast %cst_46 : f32 to vector<5x16xf32>
    %169 = arith.maximumf %167, %168 : vector<5x16xf32>
    %cst_47 = arith.constant dense<0.000000e+00> : vector<4x16xf32>
    %170 = tpu.matmul %5, %169, %cst_47 {dimension_numbers = #tpu.dot_dimension_numbers<[1], [0], [0], [1], [0, 0, 1, 1], [], []>} : vector<4x5xf32>, vector<5x16xf32>, vector<4x16xf32> -> vector<4x16xf32>
    %171 = vector.broadcast %6 : vector<4x1xf32> to vector<4x16xf32>
    %172 = arith.addf %170, %171 : vector<4x16xf32>
    %cst_48 = arith.constant 5.000000e-01 : f32
    %173 = vector.broadcast %cst_48 : f32 to vector<4x16xf32>
    %174 = arith.mulf %173, %172 : vector<4x16xf32>
    %175 = math.tanh %174 : vector<4x16xf32>
    %cst_49 = arith.constant 5.000000e-01 : f32
    %176 = vector.broadcast %cst_49 : f32 to vector<4x16xf32>
    %177 = arith.mulf %176, %175 : vector<4x16xf32>
    %cst_50 = arith.constant 5.000000e-01 : f32
    %178 = vector.broadcast %cst_50 : f32 to vector<4x16xf32>
    %179 = arith.addf %177, %178 : vector<4x16xf32>
    %cst_51 = arith.constant dense<0.000000e+00> : vector<4x16xf32>
    %180 = vector.multi_reduction <add>, %161, %cst_51 [2] : vector<4x16x16xf32> to vector<4x16xf32>
    %cst_52 = arith.constant 1.600000e+01 : f32
    %181 = vector.broadcast %cst_52 : f32 to vector<4x16xf32>
    %182 = arith.divf %180, %181 : vector<4x16xf32>
    %cst_53 = arith.constant dense<0.000000e+00> : vector<5x16xf32>
    %183 = tpu.matmul %3, %182, %cst_53 {dimension_numbers = #tpu.dot_dimension_numbers<[1], [0], [0], [1], [0, 0, 1, 1], [], []>} : vector<5x4xf32>, vector<4x16xf32>, vector<5x16xf32> -> vector<5x16xf32>
    %184 = vector.broadcast %4 : vector<5x1xf32> to vector<5x16xf32>
    %185 = arith.addf %183, %184 : vector<5x16xf32>
    %cst_54 = arith.constant 0.000000e+00 : f32
    %186 = vector.broadcast %cst_54 : f32 to vector<5x16xf32>
    %187 = arith.maximumf %185, %186 : vector<5x16xf32>
    %cst_55 = arith.constant dense<0.000000e+00> : vector<4x16xf32>
    %188 = tpu.matmul %5, %187, %cst_55 {dimension_numbers = #tpu.dot_dimension_numbers<[1], [0], [0], [1], [0, 0, 1, 1], [], []>} : vector<4x5xf32>, vector<5x16xf32>, vector<4x16xf32> -> vector<4x16xf32>
    %189 = vector.broadcast %6 : vector<4x1xf32> to vector<4x16xf32>
    %190 = arith.addf %188, %189 : vector<4x16xf32>
    %cst_56 = arith.constant 5.000000e-01 : f32
    %191 = vector.broadcast %cst_56 : f32 to vector<4x16xf32>
    %192 = arith.mulf %191, %190 : vector<4x16xf32>
    %193 = math.tanh %192 : vector<4x16xf32>
    %cst_57 = arith.constant 5.000000e-01 : f32
    %194 = vector.broadcast %cst_57 : f32 to vector<4x16xf32>
    %195 = arith.mulf %194, %193 : vector<4x16xf32>
    %cst_58 = arith.constant 5.000000e-01 : f32
    %196 = vector.broadcast %cst_58 : f32 to vector<4x16xf32>
    %197 = arith.addf %195, %196 : vector<4x16xf32>
    %198 = vector.broadcast %7 : vector<4x1xf32> to vector<4x16xf32>
    %199 = arith.mulf %197, %198 : vector<4x16xf32>
    %200 = arith.truncf %199 : vector<4x16xf32> to vector<4x16xbf16>
    %201 = arith.extf %200 : vector<4x16xbf16> to vector<4x16xf32>
    %202 = arith.subf %199, %201 : vector<4x16xf32>
    %cst_59 = arith.constant dense<0.000000e+00> : vector<4x256xf32>
    %203 = tpu.matmul %201, %23, %cst_59 {dimension_numbers = #tpu.dot_dimension_numbers<[1], [0], [0], [1], [0, 0, 1, 1], [], []>} : vector<4x16xf32>, vector<16x256xf32>, vector<4x256xf32> -> vector<4x256xf32>
    %cst_60 = arith.constant dense<0.000000e+00> : vector<4x256xf32>
    %204 = tpu.matmul %202, %23, %cst_60 {dimension_numbers = #tpu.dot_dimension_numbers<[1], [0], [0], [1], [0, 0, 1, 1], [], []>} : vector<4x16xf32>, vector<16x256xf32>, vector<4x256xf32> -> vector<4x256xf32>
    %205 = arith.addf %203, %204 : vector<4x256xf32>
    %206 = arith.truncf %179 : vector<4x16xf32> to vector<4x16xbf16>
    %207 = arith.extf %206 : vector<4x16xbf16> to vector<4x16xf32>
    %208 = arith.subf %179, %207 : vector<4x16xf32>
    %cst_61 = arith.constant dense<0.000000e+00> : vector<4x256xf32>
    %209 = tpu.matmul %207, %30, %cst_61 {dimension_numbers = #tpu.dot_dimension_numbers<[1], [0], [0], [1], [0, 0, 1, 1], [], []>} : vector<4x16xf32>, vector<16x256xf32>, vector<4x256xf32> -> vector<4x256xf32>
    %cst_62 = arith.constant dense<0.000000e+00> : vector<4x256xf32>
    %210 = tpu.matmul %208, %30, %cst_62 {dimension_numbers = #tpu.dot_dimension_numbers<[1], [0], [0], [1], [0, 0, 1, 1], [], []>} : vector<4x16xf32>, vector<16x256xf32>, vector<4x256xf32> -> vector<4x256xf32>
    %211 = arith.addf %209, %210 : vector<4x256xf32>
    %212 = arith.mulf %205, %211 : vector<4x256xf32>
    %cst_63 = arith.constant dense<0.000000e+00> : vector<256xf32>
    %213 = vector.multi_reduction <add>, %212, %cst_63 [0] : vector<4x256xf32> to vector<256xf32>
    %214 = vector.shape_cast %213 : vector<256xf32> to vector<1x256xf32>
    %215 = vector.broadcast %12 : vector<1x1xf32> to vector<1x256xf32>
    %216 = arith.addf %214, %215 : vector<1x256xf32>
    %217 = vector.broadcast %216 : vector<1x256xf32> to vector<23x256xf32>
    %218 = vector.broadcast %1 : vector<23x1xf32> to vector<23x256xf32>
    %219 = arith.cmpf ogt, %217, %218 : vector<23x256xf32>
    %cst_64 = arith.constant 1.000000e+00 : f32
    %cst_65 = arith.constant 0.000000e+00 : f32
    %220 = vector.broadcast %cst_64 : f32 to vector<23x256xf32>
    %221 = vector.broadcast %cst_65 : f32 to vector<23x256xf32>
    %222 = arith.select %219, %220, %221 : vector<23x256xi1>, vector<23x256xf32>
    %cst_66 = arith.constant dense<0.000000e+00> : vector<4x256xf32>
    %223 = tpu.matmul %32, %222, %cst_66 {dimension_numbers = #tpu.dot_dimension_numbers<[1], [0], [0], [1], [0, 0, 1, 1], [], []>} : vector<4x23xf32>, vector<23x256xf32>, vector<4x256xf32> -> vector<4x256xf32>
    %cst_67 = arith.constant dense<0.000000e+00> : vector<4x256xf32>
    %224 = tpu.matmul %33, %222, %cst_67 {dimension_numbers = #tpu.dot_dimension_numbers<[1], [0], [0], [1], [0, 0, 1, 1], [], []>} : vector<4x23xf32>, vector<23x256xf32>, vector<4x256xf32> -> vector<4x256xf32>
    %225 = arith.addf %223, %224 : vector<4x256xf32>
    %c1_68 = arith.constant 1 : index
    %c0_69 = arith.constant 0 : index
    %c0_70 = arith.constant 0 : index
    %226 = vector.load %arg1[%c1_68, %c0_69, %c0_70] : memref<2x4x256xf32, #tpu.memory_space<vmem>>, vector<1x4x256xf32>
    %227 = vector.shape_cast %226 : vector<1x4x256xf32> to vector<4x256xf32>
    %228 = vector.broadcast %216 : vector<1x256xf32> to vector<4x256xf32>
    %229 = arith.mulf %228, %225 : vector<4x256xf32>
    %230 = vector.broadcast %8 : vector<4x1xf32> to vector<4x256xf32>
    %231 = arith.addf %229, %230 : vector<4x256xf32>
    %232 = arith.mulf %231, %227 : vector<4x256xf32>
    %cst_71 = arith.constant 0.000000e+00 : f32
    %233 = vector.broadcast %cst_71 : f32 to vector<4x256xf32>
    %234 = vector.extract_strided_slice %10 {offsets = [0, 0], sizes = [4, 1], strides = [1, 1]} : vector<4x4xf32> to vector<4x1xf32>
    %235 = vector.extract_strided_slice %227 {offsets = [0, 0], sizes = [1, 256], strides = [1, 1]} : vector<4x256xf32> to vector<1x256xf32>
    %236 = vector.broadcast %234 : vector<4x1xf32> to vector<4x256xf32>
    %237 = vector.broadcast %235 : vector<1x256xf32> to vector<4x256xf32>
    %238 = arith.mulf %236, %237 : vector<4x256xf32>
    %239 = arith.addf %233, %238 : vector<4x256xf32>
    %240 = vector.extract_strided_slice %11 {offsets = [0, 0], sizes = [4, 1], strides = [1, 1]} : vector<4x4xf32> to vector<4x1xf32>
    %241 = vector.extract_strided_slice %232 {offsets = [0, 0], sizes = [1, 256], strides = [1, 1]} : vector<4x256xf32> to vector<1x256xf32>
    %242 = vector.broadcast %240 : vector<4x1xf32> to vector<4x256xf32>
    %243 = vector.broadcast %241 : vector<1x256xf32> to vector<4x256xf32>
    %244 = arith.mulf %242, %243 : vector<4x256xf32>
    %245 = arith.addf %239, %244 : vector<4x256xf32>
    %246 = vector.extract_strided_slice %10 {offsets = [0, 1], sizes = [4, 1], strides = [1, 1]} : vector<4x4xf32> to vector<4x1xf32>
    %247 = vector.extract_strided_slice %227 {offsets = [1, 0], sizes = [1, 256], strides = [1, 1]} : vector<4x256xf32> to vector<1x256xf32>
    %248 = vector.broadcast %246 : vector<4x1xf32> to vector<4x256xf32>
    %249 = vector.broadcast %247 : vector<1x256xf32> to vector<4x256xf32>
    %250 = arith.mulf %248, %249 : vector<4x256xf32>
    %251 = arith.addf %245, %250 : vector<4x256xf32>
    %252 = vector.extract_strided_slice %11 {offsets = [0, 1], sizes = [4, 1], strides = [1, 1]} : vector<4x4xf32> to vector<4x1xf32>
    %253 = vector.extract_strided_slice %232 {offsets = [1, 0], sizes = [1, 256], strides = [1, 1]} : vector<4x256xf32> to vector<1x256xf32>
    %254 = vector.broadcast %252 : vector<4x1xf32> to vector<4x256xf32>
    %255 = vector.broadcast %253 : vector<1x256xf32> to vector<4x256xf32>
    %256 = arith.mulf %254, %255 : vector<4x256xf32>
    %257 = arith.addf %251, %256 : vector<4x256xf32>
    %258 = vector.extract_strided_slice %10 {offsets = [0, 2], sizes = [4, 1], strides = [1, 1]} : vector<4x4xf32> to vector<4x1xf32>
    %259 = vector.extract_strided_slice %227 {offsets = [2, 0], sizes = [1, 256], strides = [1, 1]} : vector<4x256xf32> to vector<1x256xf32>
    %260 = vector.broadcast %258 : vector<4x1xf32> to vector<4x256xf32>
    %261 = vector.broadcast %259 : vector<1x256xf32> to vector<4x256xf32>
    %262 = arith.mulf %260, %261 : vector<4x256xf32>
    %263 = arith.addf %257, %262 : vector<4x256xf32>
    %264 = vector.extract_strided_slice %11 {offsets = [0, 2], sizes = [4, 1], strides = [1, 1]} : vector<4x4xf32> to vector<4x1xf32>
    %265 = vector.extract_strided_slice %232 {offsets = [2, 0], sizes = [1, 256], strides = [1, 1]} : vector<4x256xf32> to vector<1x256xf32>
    %266 = vector.broadcast %264 : vector<4x1xf32> to vector<4x256xf32>
    %267 = vector.broadcast %265 : vector<1x256xf32> to vector<4x256xf32>
    %268 = arith.mulf %266, %267 : vector<4x256xf32>
    %269 = arith.addf %263, %268 : vector<4x256xf32>
    %270 = vector.extract_strided_slice %10 {offsets = [0, 3], sizes = [4, 1], strides = [1, 1]} : vector<4x4xf32> to vector<4x1xf32>
    %271 = vector.extract_strided_slice %227 {offsets = [3, 0], sizes = [1, 256], strides = [1, 1]} : vector<4x256xf32> to vector<1x256xf32>
    %272 = vector.broadcast %270 : vector<4x1xf32> to vector<4x256xf32>
    %273 = vector.broadcast %271 : vector<1x256xf32> to vector<4x256xf32>
    %274 = arith.mulf %272, %273 : vector<4x256xf32>
    %275 = arith.addf %269, %274 : vector<4x256xf32>
    %276 = vector.extract_strided_slice %11 {offsets = [0, 3], sizes = [4, 1], strides = [1, 1]} : vector<4x4xf32> to vector<4x1xf32>
    %277 = vector.extract_strided_slice %232 {offsets = [3, 0], sizes = [1, 256], strides = [1, 1]} : vector<4x256xf32> to vector<1x256xf32>
    %278 = vector.broadcast %276 : vector<4x1xf32> to vector<4x256xf32>
    %279 = vector.broadcast %277 : vector<1x256xf32> to vector<4x256xf32>
    %280 = arith.mulf %278, %279 : vector<4x256xf32>
    %281 = arith.addf %275, %280 : vector<4x256xf32>
    %282 = vector.broadcast %9 : vector<4x1xf32> to vector<4x256xf32>
    %283 = arith.addf %281, %282 : vector<4x256xf32>
    %cst_72 = arith.constant 0.000000e+00 : f32
    %284 = vector.broadcast %cst_72 : f32 to vector<4x256xf32>
    %285 = arith.maximumf %283, %284 : vector<4x256xf32>
    %286 = vector.shape_cast %159 : vector<4x256xf32> to vector<1x4x256xf32>
    %287 = vector.shape_cast %285 : vector<4x256xf32> to vector<1x4x256xf32>
    %288 = tpu.concatenate %286, %287 in 0 : vector<1x4x256xf32>, vector<1x4x256xf32> -> vector<2x4x256xf32>
    %c0_73 = arith.constant 0 : index
    %c0_74 = arith.constant 0 : index
    %c0_75 = arith.constant 0 : index
    %289 = vector.load %arg3[%c0_73, %c0_74, %c0_75] : memref<2x4x256xf32, #tpu.memory_space<vmem>>, vector<2x4x256xf32>
    tpu.vector_store %arg3[%c0_73, %c0_74, %c0_75], %288 {strides = array<i32>} : memref<2x4x256xf32, #tpu.memory_space<vmem>>, vector<2x4x256xf32>,
    return
  }
}

</mosaic_0001>

<bundles_post_ra>
// kernel: _dtfa_block.1
= control target key start
LH: loop header
LB: loop body
LE: loop exit
PB: predicated region body
PF: predicated region fallthrough
CT: control target
= control target key end

     0   :  { %vm62_vm0 = vcmask 130048   ;;  %v2557_v1 = vmov 0.0   ;;  %vm2558_vm1 = vmmov 0   ;;  %s2559_s18 = smov 104   ;;  %v2560_v24 = vmov 28   ;;  %s2561_s4 = smov 99   ;;  %s3140_s2 = inlined_call_operand.vmem [shape: f32[23,47], index: 2, kind: input, shape index: {}]   ;;  %s3141_s0 = inlined_call_operand.vmem [shape: f32[2,4,16,16], index: 0, kind: input, shape index: {}]   ;;  %s3142_s1 = inlined_call_operand.vmem [shape: f32[2,4,256], index: 1, kind: input, shape index: {}]   ;;  %s3143_s3 = inlined_call_operand.vmem [shape: f32[2,4,256], index: 3, kind: output, shape index: {}]  }
   0x1   :  { %v2601_v0 = vld [vmem:[%s3140_s2] sm:$0xff]  ;;  %2411 = vmatprep.subr.mxu0 %v2557_v1  ;;  %2413 = vmatprep.mubr.msk.f32.mxu0 %vm2558_vm1, %v2557_v1  ;;  %v55_v3 = vld [vmem:[%s3141_s0 + $0x8] sm:$0xff]  ;;  %v56_v4 = vld [vmem:[%s3141_s0 + $0x10] sm:$0xff]  ;;  %vm115_vm2 = vcmask 1041409   ;;  %vm117_vm3 = vcmask 1042434   ;;  %vm119_vm4 = vcmask 1043459   ;;  %v17_v60 = vlaneseq }
   0x2   :  { %v54_v2 = vld [vmem:[%s3141_s0] sm:$0xff]  ;;  %109 = vrot.lane.b32.xlu0 %v2601_v0, %s2559_s18  ;;  %v57_v5 = vld [vmem:[%s3141_s0 + $0x18] sm:$0xff]  ;;  %v64_v8 = vsel %vm62_vm0, %v55_v3, 0.0  ;;  %2426 = vmatprep.subr.mxu1 %v2557_v1  ;;  %v59_v9 = vld [vmem:[%s3141_s0 + $0x28] sm:$0xff]  ;;  %v72_v13 = vsel %vm62_vm0, %v56_v4, 0.0  ;;  %vm3145_vm5 = vcmask 1043456  }
   0x3   :  { %v58_v6 = vld [vmem:[%s3141_s0 + $0x20] sm:$0xff]  ;;  %v63_v7 = vsel %vm62_vm0, %v54_v2, 0.0  ;;  %v60_v10 = vld [vmem:[%s3141_s0 + $0x30] sm:$0xff]  ;;  %v61_v11 = vld [vmem:[%s3141_s0 + $0x38] sm:$0xff]  ;;  %v73_v14 = vsel %vm62_vm0, %v57_v5, 0.0  ;;  %287 = vadd.xlane.f32.xlu1 %v64_v8  ;;  %2428 = vmatprep.mubr.msk.f32.mxu1 %vm2558_vm1, %v2557_v1  ;;  %v82_v17 = vsel %vm62_vm0, %v59_v9, 0.0 }
   0x4   :  { %v65_v12 = vadd.f32 %v64_v8, %v63_v7  ;;  %v81_v15 = vsel %vm62_vm0, %v58_v6, 0.0  ;;  %v74_v16 = vadd.f32 %v73_v14, %v72_v13  ;;  %v90_v18 = vsel %vm62_vm0, %v60_v10, 0.0  ;;  %2532 = vset.pattern.permute.xlu1 %v2560_v24  ;;  %s2567_s24 = smov 127  }
   0x5   :  { %v91_v19 = vsel %vm62_vm0, %v61_v11, 0.0  ;;  %v83_v21 = vadd.f32 %v82_v17, %v81_v15  ;;  %vm121_vm6 = vcmask 31744   ;;  %v2562_v55 = vmov 34  }
   0x6   :  { %v66_v20 = vrot.slane %v65_v12, 4  ;;  %v92_v22 = vadd.f32 %v91_v19, %v90_v18  ;;  %v75_v23 = vrot.slane %v74_v16, 4  ;;  %v2656_v61 = vand.u32 127, %v17_v60 }
   0x7   :  { %v84_v26 = vrot.slane %v83_v21, 4  ;;  %289 = vadd.xlane.f32.xlu1 %v72_v13  ;;  %v2658_v63 = vshrl.u32 %v17_v60, 7  ;;  %vm326_vm7 = vcmask 130112   ;;  %vm207_vm8 = vcmask 1044480  }
   0x8   :  { %v67_v25 = vadd.f32 %v66_v20, %v65_v12  ;;  %v93_v27 = vrot.slane %v92_v22, 4  ;;  %v76_v28 = vadd.f32 %v75_v23, %v74_v16  ;;  %v321_v2 = vadd.s32 4294967288, %v2656_v61 }
   0x9   :  { %v85_v30 = vadd.f32 %v84_v26, %v83_v21  ;;  %v2666_v6 = vsub.s32 %v2656_v61, %v2658_v63  ;;  %vm3144_vm9 = vcmask 39936  }
   0xa   :  { %v68_v29 = vrot.slane %v67_v25, 2  ;;  %v94_v31 = vadd.f32 %v93_v27, %v92_v22  ;;  %v77_v32 = vrot.slane %v76_v28, 2  ;;  %v2662_v5 = vsub.s32 %v321_v2, %v2658_v63 }
   0xb   :  { %v86_v34 = vrot.slane %v85_v30, 2  ;;  %291 = vadd.xlane.f32.xlu1 %v73_v14 }
   0xc   :  { %v69_v33 = vadd.f32 %v68_v29, %v67_v25  ;;  %v95_v35 = vrot.slane %v94_v31, 2  ;;  %v78_v36 = vadd.f32 %v77_v32, %v76_v28 }
   0xd   :  { %v87_v38 = vadd.f32 %v86_v34, %v85_v30 }
   0xe   :  { %v70_v37 = vrot.slane %v69_v33, 1  ;;  %v96_v39 = vadd.f32 %v95_v35, %v94_v31  ;;  %v79_v40 = vrot.slane %v78_v36, 1 }
   0xf   :  { %v88_v42 = vrot.slane %v87_v38, 1  ;;  %293 = vadd.xlane.f32.xlu1 %v81_v15 }
  0x10   :  { %v71_v41 = vadd.f32 %v70_v37, %v69_v33  ;;  %v97_v43 = vrot.slane %v96_v39, 1  ;;  %v80_v44 = vadd.f32 %v79_v40, %v78_v36  ;;  %v2344_v37 = vld [vmem:[%s3141_s0 + $0x40] sm:$0xff]  ;;  %v2347_v40 = vld [vmem:[%s3141_s0 + $0x58] sm:$0xff] }
  0x11   :  { %v89_v45 = vadd.f32 %v88_v42, %v87_v38  ;;  %v2345_v38 = vld [vmem:[%s3141_s0 + $0x48] sm:$0xff]  ;;  %v1230_v42 = vsel %vm62_vm0, %v2344_v37, 0.0 }
  0x12   :  { %v98_v46 = vadd.f32 %v97_v43, %v96_v39  ;;  %v100_v47 = vmul.f32 0.0625, %v71_v41  ;;  %v101_v48 = vmul.f32 0.0625, %v80_v44  ;;  %v2346_v39 = vld [vmem:[%s3141_s0 + $0x50] sm:$0xff]  ;;  %v2348_v41 = vld [vmem:[%s3141_s0 + $0x60] sm:$0xff]  ;;  %v1231_v43 = vsel %vm62_vm0, %v2345_v38, 0.0  ;;  %v2349_v44 = vld [vmem:[%s3141_s0 + $0x68] sm:$0xff] }
  0x13   :  { %v102_v49 = vmul.f32 0.0625, %v89_v45  ;;  %295 = vadd.xlane.f32.xlu1 %v82_v17  ;;  %v1232_v45 = vadd.f32 %v1231_v43, %v1230_v42 }
  0x14   :  { %v103_v50 = vmul.f32 0.0625, %v98_v46  ;;  %v116_v51 = vsel %vm115_vm2, %v101_v48, %v100_v47  ;;  %v2350_v46 = vld [vmem:[%s3141_s0 + $0x70] sm:$0xff]  ;;  %v1239_v47 = vsel %vm62_vm0, %v2346_v39, 0.0  ;;  %v1240_v48 = vsel %vm62_vm0, %v2347_v40, 0.0 }
  0x15   :  { %v118_v52 = vsel %vm117_vm3, %v102_v49, %v116_v51  ;;  %v1248_v49 = vsel %vm62_vm0, %v2348_v41, 0.0  ;;  %v1233_v51 = vrot.slane %v1232_v45, 4  ;;  %v24_v41 = vadd.s32 8, %v2658_v63 }
  0x16   :  { %v120_v53 = vsel %vm119_vm4, %v103_v50, %v118_v52  ;;  %v2351_v50 = vld [vmem:[%s3141_s0 + $0x78] sm:$0xff]  ;;  %v1241_v52 = vadd.f32 %v1240_v48, %v1239_v47 }
  0x17   :  { %2412 = vmatpush3.msk.msra.mxu0 %vm3145_vm5, %v120_v53  ;;  %297 = vadd.xlane.f32.xlu1 %v90_v18  ;;  %v1249_v53 = vsel %vm62_vm0, %v2349_v44, 0.0 }
  0x18   :  { %2416 = vmatprep.subr.mxu0 %v2557_v1 }
  0x1b   :  { %299 = vadd.xlane.f32.xlu1 %v91_v19 }
  0x21   :  { %285 = vadd.xlane.f32.xlu0 %v63_v7 }
  0x2c   :  { %106 = vperm.xlu1 %2532, %v2601_v0  }
  0x30   :  { %2533 = vset.pattern.permute.xlu1 %v2562_v55  ;;  %v1234_v55 = vadd.f32 %v1233_v51, %v1232_v45 }
  0x31   :  { %199 = vperm.xlu1 %2533, %v2601_v0  }
  0x32   :  { %v1235_v60 = vrot.slane %v1234_v55, 2 }
  0x37   :  { %202 = vrot.lane.b32.xlu0 %v2601_v0, %s2561_s4 }
  0x56   :  { %1429 = vadd.xlane.f32.xlu0 %v1231_v43 }
  0x5a   :  { %1431 = vadd.xlane.f32.xlu0 %v1239_v47  ;;  %v26_v47 = vcvt.s32.f32 %v24_v41 }
  0x5e   :  { %1435 = vadd.xlane.f32.xlu0 %v1248_v49 }
  0x74   :  { %v2649_v54 = vpop.permute.xlu0 %109 }
  0x75   :  { %2414 = vmatmul.mubr.msk.f32.vlgmr.msra.gmra.mrb[0].mxu0 %vm121_vm6, %v2649_v54 }
  0x76   :  { %2418 = vmatprep.mubr.msk.f32.mxu0 %vm2558_vm1, %v2557_v1 }
  0x90   :  { %v288_v56 = vpop.xlane.xlu1 %287 }
  0x91   :  { %v302_v7 = vmul.f32 0.0625, %v288_v56  ;;  %v1242_v56 = vrot.slane %v1241_v52, 4 }
  0x93   :  { %v325_v14 = vrot.slane %v302_v7, %v2662_v5 }
  0x94   :  { %v290_v57 = vpop.xlane.xlu1 %289 }
  0x95   :  { %v303_v8 = vmul.f32 0.0625, %v290_v57  ;;  %v1250_v57 = vadd.f32 %v1249_v53, %v1248_v49 }
  0x97   :  { %v331_v15 = vrot.slane %v303_v8, %v2666_v6  ;;  %v1251_v2 = vrot.slane %v1250_v57, 4 }
  0x98   :  { %v292_v58 = vpop.xlane.xlu1 %291 }
  0x99   :  { %v304_v9 = vmul.f32 0.0625, %v292_v58  ;;  %v1257_v58 = vsel %vm62_vm0, %v2350_v46, 0.0  ;;  %v1252_v8 = vadd.f32 %v1251_v2, %v1250_v57 }
  0x9a   :  { %1439 = vadd.xlane.f32.xlu0 %v1257_v58 }
  0x9b   :  { %v335_v16 = vrot.slane %v304_v9, %v2662_v5 }
  0x9c   :  { %v294_v59 = vpop.xlane.xlu1 %293 }
  0x9d   :  { %v305_v11 = vmul.f32 0.0625, %v294_v59  ;;  %v336_v22 = vsel %vm326_vm7, %v335_v16, %v331_v15  ;;  %v1258_v59 = vsel %vm62_vm0, %v2351_v50, 0.0 }
  0x9f   :  { %v340_v20 = vrot.slane %v305_v11, %v2666_v6 }
  0xa0   :  { %v296_v62 = vpop.xlane.xlu1 %295 }
  0xa1   :  { %v306_v12 = vmul.f32 0.0625, %v296_v62  ;;  %v1243_v62 = vadd.f32 %v1242_v56, %v1241_v52 }
  0xa3   :  { %v344_v21 = vrot.slane %v306_v12, %v2662_v5  ;;  %v1244_v7 = vrot.slane %v1243_v62, 2  ;;  %v1253_v12 = vrot.slane %v1252_v8, 2 }
  0xa4   :  { %v298_v3 = vpop.xlane.xlu1 %297 }
  0xa5   :  { %v307_v18 = vmul.f32 0.0625, %v298_v3  ;;  %v345_v27 = vsel %vm326_vm7, %v344_v21, %v340_v20  ;;  %v1259_v3 = vadd.f32 %v1258_v59, %v1257_v58  ;;  %v1245_v11 = vadd.f32 %v1244_v7, %v1243_v62 }
  0xa6   :  { %v1254_v16 = vadd.f32 %v1253_v12, %v1252_v8  ;;  %v51_v12 = vpack.c.bf16 %v2601_v0, %v2601_v0 }
  0xa7   :  { %v349_v25 = vrot.slane %v307_v18, %v2666_v6  ;;  %v1260_v9 = vrot.slane %v1259_v3, 4  ;;  %v1246_v15 = vrot.slane %v1245_v11, 1 }
  0xa8   :  { %v300_v13 = vpop.xlane.xlu1 %299 }
  0xa9   :  { %v308_v19 = vmul.f32 0.0625, %v300_v13  ;;  %v1261_v13 = vadd.f32 %v1260_v9, %v1259_v3  ;;  %v1247_v18 = vadd.f32 %v1246_v15, %v1245_v11  ;;  %v2566_v11 = vmov 46   ;;  %v16_v15 = vld [vmem:[%s3140_s2 + $0x10] sm:$0x7f] }
  0xaa   :  { %2535 = vset.pattern.permute.xlu0 %v2566_v11 }
  0xab   :  { %v353_v26 = vrot.slane %v308_v19, %v2662_v5  ;;  %v1255_v19 = vrot.slane %v1254_v16, 1 }
  0xac   :  { %v2676_v24 = vpop.permute.xlu1 %106 }
  0xad   :  { %v354_v32 = vsel %vm326_vm7, %v353_v26, %v349_v25  ;;  %v1267_v25 = vmul.f32 0.0625, %v1247_v18 }
  0xae   :  { %v286_v4 = vpop.xlane.xlu0 %285 }
  0xaf   :  { %v301_v10 = vmul.f32 0.0625, %v286_v4  ;;  %v1236_v4 = vadd.f32 %v1235_v60, %v1234_v55 }
  0xb0   :  { %v2737_v45 = vpop.permute.xlu1 %199  ;;  %832 = vperm.xlu0 %2535, %v2601_v0  }
  0xb1   :  { %v320_v17 = vrot.slane %v301_v10, %v2666_v6  ;;  %v1237_v10 = vrot.slane %v1236_v4, 1 }
  0xb2   :  { %v2684_v34 = vpop.permute.xlu0 %202 }
  0xb3   :  { %v327_v23 = vsel %vm326_vm7, %v325_v14, %v320_v17  ;;  %v1238_v14 = vadd.f32 %v1237_v10, %v1236_v4  ;;  %v1262_v17 = vrot.slane %v1261_v13, 2  ;;  %v2565_v10 = vmov 0  }
  0xb4   :  { %v355_v28 = vsel %vm115_vm2, %v336_v22, %v327_v23  ;;  %v1256_v22 = vadd.f32 %v1255_v19, %v1254_v16 }
  0xb5   :  { %v356_v35 = vsel %vm117_vm3, %v345_v27, %v355_v28  ;;  %v1263_v20 = vadd.f32 %v1262_v17, %v1261_v13  ;;  %v1266_v21 = vmul.f32 0.0625, %v1238_v14  ;;  %v15_v13 = vld [vmem:[%s3140_s2 + $0x8] sm:$0xff]  ;;  %v52_v14 = vunpack.c.l.bf16 %v51_v12 }
  0xb6   :  { %v357_v36 = vsel %vm119_vm4, %v354_v32, %v356_v35  ;;  %v1268_v27 = vmul.f32 0.0625, %v1256_v22 }
  0xb7   :  { %v1264_v23 = vrot.slane %v1263_v20, 1  ;;  %v1274_v28 = vsel %vm115_vm2, %v1267_v25, %v1266_v21  ;;  %v53_v16 = vsub.f32 %v2601_v0, %v52_v14 }
  0xb9   :  { %v1265_v26 = vadd.f32 %v1264_v23, %v1263_v20 }
  0xe3   :  { %v1430_v20 = vpop.xlane.xlu0 %1429 }
 0x148   :  { %v193_v29 = vpop.f32.mrb[0].mxu0 }
 0x149   :  { %v194_v30 = vadd.f32 %v193_v29, %v2676_v24  ;;  %v2415_v31 = vpop.f32.mrb[1].mxu0  ;;  %v1269_v29 = vmul.f32 0.0625, %v1265_v26  ;;  %v1432_v26 = vpop.xlane.xlu0 %1431 }
 0x14a   :  { %v2563_v31 = vmov 35  }
 0x14b   :  { %v197_v33 = vmax.f32 %v194_v30, 0.0  ;;  %v1275_v30 = vsel %vm117_vm3, %v1268_v27, %v1274_v28  ;;  %2534 = vset.pattern.permute.xlu1 %v2563_v31  ;;  %v1444_v31 = vmul.f32 0.0625, %v1430_v20  ;;  %v2572_v20 = vmov 42  }
 0x14c   :  { %v1276_v32 = vsel %vm119_vm4, %v1269_v29, %v1275_v30  ;;  %509 = vperm.xlu1 %2534, %v2601_v0  }
 0x14d   :  { %2417 = vmatpush3.msk.msra.mxu0 %vm207_vm8, %v197_v33  ;;  %v19_v33 = vadd.s32 128, %v2656_v61  ;;  %v1436_v28 = vpop.xlane.xlu0 %1435 }
 0x14e   :  { %2419 = vmatmul.mubr.msk.f32.vlgmr.msra.gmra.mrb[2].mxu0 %vm3144_vm9, %v2684_v34  ;;  %2421 = vmatprep.subr.mxu0 %v2557_v1 }
 0x14f   :  { %2422 = vmatpush3.msk.msra.mxu0 %vm3145_vm5, %v357_v36  ;;  %2423 = vmatprep.mubr.msk.f32.mxu0 %vm2558_vm1, %v2557_v1  ;;  %v21_v35 = vcvt.s32.f32 %v19_v33  ;;  %v20_v36 = vcvt.s32.f32 %v2656_v61  ;;  %v1445_v33 = vmul.f32 0.0625, %v1432_v26  ;;  %v2575_v26 = vmov 40  }
 0x150   :  { %2536 = vset.pattern.permute.xlu1 %v2565_v10 }
 0x151   :  { %v28_v37 = vmul.f32 0.0625, %v21_v35  ;;  %v27_v38 = vmul.f32 0.0625, %v20_v36 }
 0x152   :  { %2424 = vmatmul.mubr.msk.f32.vlgmr.msra.gmra.mrb[4].mxu0 %vm121_vm6, %v2649_v54 }
 0x153   :  { %583 = vmatprep.mubr.f32.mxu0 %v2557_v1  ;;  %v30_v39 = vfloor.f32 %v28_v37  ;;  %v29_v40 = vfloor.f32 %v27_v38  ;;  %v1447_v38 = vmul.f32 0.0625, %v1436_v28  ;;  %v2577_v28 = vmov 45  }
 0x155   :  { %v40_v43 = vmul.f32 16.0, %v30_v39  ;;  %v39_v44 = vmul.f32 16.0, %v29_v40 }
 0x157   :  { %v41_v51 = vsub.f32 %v20_v36, %v39_v44 }
 0x159   :  { %vm45_vm13 = vcmp.eq.f32.partialorder %v41_v51, %v26_v47 }
 0x170   :  { %1427 = vadd.xlane.f32.xlu1 %v1230_v42  ;;  %v25_v42 = vcvt.s32.f32 %v2658_v63 }
 0x172   :  { %vm43_vm12 = vcmp.eq.f32.partialorder %v41_v51, %v25_v42  ;;  %v1480_v51 = vrot.slane %v1447_v38, %v2666_v6 }
 0x173   :  { %vm2746_vm15 = vmpackc.low %vm45_vm13, %vm43_vm12  ;;  %vm31_vm13 = vcmp.eq.f32.partialorder %v29_v40, %v25_v42 }
 0x174   :  { %1433 = vadd.xlane.f32.xlu1 %v1240_v48  ;;  %v42_v48 = vsub.f32 %v21_v35, %v40_v43  ;;  %v1466_v43 = vrot.slane %v1444_v31, %v2662_v5 }
 0x176   :  { %vm44_vm10 = vcmp.eq.f32.partialorder %v42_v48, %v25_v42  ;;  %vm46_vm11 = vcmp.eq.f32.partialorder %v42_v48, %v26_v47 }
 0x177   :  { %vm2742_vm14 = vmpackc.low %vm46_vm11, %vm44_vm10  ;;  %vm32_vm10 = vcmp.eq.f32.partialorder %v30_v39, %v25_v42  ;;  %vm34_vm11 = vcmp.eq.f32.partialorder %v30_v39, %v26_v47 }
 0x178   :  { %1437 = vadd.xlane.f32.xlu1 %v1249_v53  ;;  %vm2778_vm12 = vmpackc.low %vm34_vm11, %vm32_vm10 }
 0x17c   :  { %1441 = vadd.xlane.f32.xlu1 %v1258_v59  ;;  %v2564_v59 = vmov 1.0|1.0  }
 0x17d   :  { %2452 = vmatprep.subr.msk.bf16.mxu0 %vm2778_vm12, %v2564_v59 }
 0x18d   :  { %846 = vperm.xlu1 %2536, %v2601_v0  }
 0x191   :  { %851 = vperm.xlu1 %2536, %v15_v13  }
 0x195   :  { %856 = vperm.xlu1 %2536, %v16_v15   ;;  %v2569_v15 = vmov 39  }
 0x196   :  { %2540 = vset.pattern.permute.xlu0 %v2569_v15 }
 0x197   :  { %1088 = vperm.xlu0 %2540, %v2601_v0  }
 0x199   :  { %872 = vrot.lane.b32.xlu1 %v53_v16, %s2567_s24  ;;  %v1055_v16 = vsub.s32 4, %v2658_v63 }
 0x19d   :  { %956 = vrot.lane.b32.xlu1 %v52_v14, %s2567_s24  ;;  %v2568_v14 = vmov 36  }
 0x19e   :  { %2537 = vset.pattern.permute.xlu1 %v2568_v14 }
 0x1a1   :  { %1035 = vperm.xlu1 %2537, %v2601_v0  }
 0x1cb   :  { %v2806_v17 = vpop.permute.xlu1 %509 }
 0x1fd   :  { %v1428_v18 = vpop.xlane.xlu1 %1427 }
 0x1fe   :  { %v1443_v30 = vmul.f32 0.0625, %v1428_v18  ;;  %v2570_v18 = vmov 38  }
 0x1ff   :  { %2538 = vset.pattern.permute.xlu1 %v2570_v18 }
 0x200   :  { %v1462_v41 = vrot.slane %v1443_v30, %v2666_v6  ;;  %1046 = vperm.xlu1 %2538, %v2601_v0  }
 0x201   :  { %v1434_v25 = vpop.xlane.xlu1 %1433 }
 0x204   :  { %2539 = vset.pattern.permute.xlu1 %v2572_v20 }
 0x205   :  { %v1438_v27 = vpop.xlane.xlu1 %1437  ;;  %1072 = vperm.xlu1 %2539, %v2601_v0  }
 0x206   :  { %v1448_v37 = vmul.f32 0.0625, %v1438_v27  ;;  %v2576_v27 = vmov 41  }
 0x209   :  { %v1442_v39 = vpop.xlane.xlu1 %1441 }
 0x221   :  { %v277_v46 = vpop.f32.mrb[2].mxu0 }
 0x222   :  { %v278_v49 = vadd.f32 %v277_v46, %v2737_v45  ;;  %v2420_v50 = vpop.f32.mrb[3].mxu0  ;;  %v1471_v46 = vrot.slane %v1445_v33, %v2666_v6 }
 0x223   :  { %v1484_v50 = vrot.slane %v1448_v37, %v2662_v5 }
 0x224   :  { %v281_v61 = vmul.f32 0.5, %v278_v49 }
 0x225   :  { %v426_v52 = vpop.f32.mrb[4].mxu0 }
 0x226   :  { %2549 = vtanh.f32 %v281_v61  ;;  %v427_v53 = vadd.f32 %v426_v52, %v2676_v24  ;;  %v2425_v55 = vpop.f32.mrb[5].mxu0  ;;  %v1467_v61 = vsel %vm326_vm7, %v1466_v43, %v1462_v41 }
 0x228   :  { %v430_v56 = vmax.f32 %v427_v53, 0.0 }
 0x22a   :  { %2427 = vmatpush3.msk.msra.mxu1 %vm207_vm8, %v430_v56 }
 0x22b   :  { %2429 = vmatmul.mubr.msk.f32.vlgmr.msra.gmra.mrb[0].mxu1 %vm3144_vm9, %v2684_v34  ;;  %2460 = vmatprep.subr.msk.bf16.mxu1 %vm2742_vm14, %v2564_v59  ;;  %vm33_vm9 = vcmp.eq.f32.partialorder %v29_v40, %v26_v47  ;;  %v1440_v40 = vpop.xlane.xlu0 %1439  ;;  %v1450_v47 = vmul.f32 0.0625, %v1442_v39 }
 0x22c   :  { %2462 = vmatpush1.bf16.msk.msra.mxu1 %vm2746_vm15, %v2564_v59  ;;  %734 = vmatprep.mubr.f32.mxu1 %v2557_v1  ;;  %v1449_v48 = vmul.f32 0.0625, %v1440_v40 }
 0x22d   :  { %2464 = vmatprep.subr.msk.bf16.mxu1 %vm2742_vm14, %v2564_v59 }
 0x230   :  { %v2550_v60 = vpop.eup %2549 }
 0x231   :  { %v283_v62 = vmul.f32 0.5, %v2550_v60  ;;  %v1493_v60 = vrot.slane %v1450_v47, %v2662_v5 }
 0x233   :  { %v284_v2 = vadd.f32 0.5, %v283_v62  ;;  %v1489_v62 = vrot.slane %v1449_v48, %v2666_v6 }
 0x235   :  { %v664_v3 = vpack.c.bf16 %v284_v2, %v284_v2  ;;  %v1494_v12 = vsel %vm326_vm7, %v1493_v60, %v1489_v62 }
 0x237   :  { %v665_v4 = vunpack.c.l.bf16 %v664_v3 }
 0x239   :  { %v666_v7 = vsub.f32 %v284_v2, %v665_v4 }
 0x23b   :  { %2324 = vmatmul.mubr.msk.f32.vlgmr.msra.gmra.mrb[2].mxu1 %vm62_vm0, %v666_v7 }
 0x23c   :  { %2466 = vmatpush1.bf16.msk.msra.mxu1 %vm2746_vm15, %v2564_v59  ;;  %808 = vmatprep.mubr.f32.mxu1 %v2557_v1 }
 0x23d   :  { %2431 = vmatprep.subr.mxu1 %v2557_v1 }
 0x243   :  { %2329 = vmatmul.mubr.msk.f32.vlgmr.msra.gmra.mrb[2].mxu1 %vm62_vm0, %v665_v4  ;;  %v1485_v4 = vsel %vm326_vm7, %v1484_v50, %v1480_v51 }
 0x244   :  { %2432 = vmatpush3.msk.msra.mxu1 %vm3145_vm5, %v1276_v32  ;;  %2433 = vmatprep.mubr.msk.f32.mxu1 %vm2558_vm1, %v2557_v1  ;;  %vm2785_vm5 = vmpackc.low %vm33_vm9, %vm31_vm13  ;;  %v1446_v32 = vmul.f32 0.0625, %v1434_v25  ;;  %vm3155_vm9 = vcmask 1043456  }
 0x245   :  { %2436 = vmatprep.subr.mxu1 %v2557_v1  ;;  %2454 = vmatpush1.bf16.msk.msra.mxu0 %vm2785_vm5, %v2564_v59 }
 0x246   :  { %2456 = vmatprep.subr.msk.bf16.mxu0 %vm2778_vm12, %v2564_v59  ;;  %v1475_v44 = vrot.slane %v1446_v32, %v2662_v5 }
 0x247   :  { %2434 = vmatmul.mubr.msk.f32.vlgmr.msra.gmra.mrb[4].mxu1 %vm121_vm6, %v2649_v54 }
 0x248   :  { %2438 = vmatprep.mubr.msk.f32.mxu1 %vm2558_vm1, %v2557_v1  ;;  %v1476_v52 = vsel %vm326_vm7, %v1475_v44, %v1471_v46 }
 0x249   :  { %v1495_v3 = vsel %vm115_vm2, %v1476_v52, %v1467_v61  ;;  %vm3154_vm2 = vcmask 39936   ;;  %v2890_v52 = vpop.permute.xlu0 %832 }
 0x24a   :  { %v1496_v5 = vsel %vm117_vm3, %v1485_v4, %v1495_v3  ;;  %vm3156_vm3 = vmmov %vm3155_vm9 }
 0x24b   :  { %v1497_v13 = vsel %vm119_vm4, %v1494_v12, %v1496_v5  ;;  %vm3157_vm4 = vmmov %vm3156_vm3 }
 0x2fe   :  { %v500_v19 = vpop.f32.mrb[0].mxu1 }
 0x2ff   :  { %v501_v21 = vadd.f32 %v500_v19, %v2737_v45  ;;  %v2430_v22 = vpop.f32.mrb[1].mxu1  ;;  %v2571_v19 = vmov 44  }
 0x300   :  { %2543 = vset.pattern.permute.xlu0 %v2571_v19  ;;  %v2574_v22 = vmov 43  }
 0x301   :  { %v504_v23 = vmul.f32 0.5, %v501_v21  ;;  %1156 = vperm.xlu0 %2543, %v2601_v0   ;;  %v2573_v21 = vmov 37   ;;  %2541 = vset.pattern.permute.xlu1 %v2574_v22 }
 0x302   :  { %1114 = vperm.xlu1 %2541, %v2601_v0  }
 0x303   :  { %2551 = vtanh.f32 %v504_v23  ;;  %v1139_v23 = vsub.s32 6, %v2658_v63 }
 0x305   :  { %2546 = vset.pattern.permute.xlu0 %v2573_v21 }
 0x306   :  { %1214 = vperm.xlu0 %2546, %v2601_v0   ;;  %2542 = vset.pattern.permute.xlu1 %v2575_v26 }
 0x307   :  { %1130 = vperm.xlu1 %2542, %v2601_v0  }
 0x30b   :  { %2544 = vset.pattern.permute.xlu1 %v2576_v27 }
 0x30c   :  { %1172 = vperm.xlu1 %2544, %v2601_v0  }
 0x30d   :  { %v2552_v29 = vpop.eup %2551 }
 0x30e   :  { %v506_v35 = vmul.f32 0.5, %v2552_v29 }
 0x310   :  { %v507_v36 = vadd.f32 0.5, %v506_v35  ;;  %2545 = vset.pattern.permute.xlu1 %v2577_v28 }
 0x311   :  { %1198 = vperm.xlu1 %2545, %v2601_v0  }
 0x312   :  { %v512_v42 = vmul.f32 %v2806_v17, %v507_v36 }
 0x314   :  { %v513_v49 = vpack.c.bf16 %v512_v42, %v512_v42 }
 0x316   :  { %v514_v53 = vunpack.c.l.bf16 %v513_v49  ;;  %v2818_v55 = vpop.f32.mrb[2].mxu1 }
 0x317   :  { %v2820_v56 = vpop.f32.mrb[3].mxu1 }
 0x318   :  { %v515_v2 = vsub.f32 %v512_v42, %v514_v53  ;;  %v2888_v42 = vpop.permute.xlu1 %846 }
 0x31a   :  { %2314 = vmatmul.mubr.msk.f32.vlgmr.msra.gmra.mrb[6].mxu0 %vm62_vm0, %v515_v2  ;;  %v1345_v7 = vpop.f32.mrb[4].mxu1 }
 0x31b   :  { %v1346_v10 = vadd.f32 %v1345_v7, %v2676_v24  ;;  %v2435_v11 = vpop.f32.mrb[5].mxu1  ;;  %2458 = vmatpush1.bf16.msk.msra.mxu0 %vm2785_vm5, %v2564_v59  ;;  %657 = vmatprep.mubr.f32.mxu0 %v2557_v1 }
 0x31d   :  { %v1349_v6 = vmax.f32 %v1346_v10, 0.0 }
 0x31f   :  { %2437 = vmatpush3.msk.msra.mxu1 %vm207_vm8, %v1349_v6 }
 0x320   :  { %2439 = vmatmul.mubr.msk.f32.vlgmr.msra.gmra.mrb[6].mxu1 %vm3154_vm2, %v2684_v34  ;;  %2441 = vmatprep.subr.mxu1 %v2557_v1  ;;  %vm877_vm2 = vcmask 1046528  }
 0x321   :  { %2442 = vmatpush3.msk.msra.mxu1 %vm3155_vm9, %v1497_v13  ;;  %2443 = vmatprep.mubr.msk.f32.mxu1 %vm2558_vm1, %v2557_v1 }
 0x322   :  { %2319 = vmatmul.mubr.msk.f32.vlgmr.msra.gmra.mrb[6].mxu0 %vm62_vm0, %v514_v53  ;;  %2476 = vmatprep.subr.msk.bf16.mxu1 %vm2778_vm12, %v2564_v59 }
 0x323   :  { %948 = vmatprep.mubr.f32.mxu0 %v2557_v1 }
 0x324   :  { %2444 = vmatmul.mubr.msk.f32.vlgmr.msra.gmra.mrb[8].mxu1 %vm121_vm6, %v2649_v54  ;;  %v2861_v54 = vld [vmem:[%s3142_s1 + $0x8] sm:$0xff] }
 0x325   :  { %2478 = vmatpush1.bf16.msk.msra.mxu1 %vm2785_vm5, %v2564_v59  ;;  %1719 = vmatprep.mubr.f32.mxu1 %v2557_v1  ;;  %v2867_v8 = vrot.slane %v2861_v54, %v1055_v16  ;;  %v2878_v25 = vrot.slane %v2861_v54, %v1139_v23 }
 0x326   :  { %2480 = vmatprep.subr.msk.bf16.mxu1 %vm2778_vm12, %v2564_v59 }
 0x3f3   :  { %v1419_v29 = vpop.f32.mrb[6].mxu1 }
 0x3f4   :  { %v2440_v30 = vpop.f32.mrb[7].mxu1  ;;  %v1420_v43 = vadd.f32 %v1419_v29, %v2737_v45  ;;  %v2975_v29 = vsub.s32 2, %v2658_v63 }
 0x3f5   :  { %v659_v31 = vpop.f32.mrb[6].mxu0 }
 0x3f6   :  { %v815_v32 = vmul.f32 %v2818_v55, %v659_v31  ;;  %v661_v33 = vpop.f32.mrb[7].mxu0  ;;  %v1423_v48 = vmul.f32 0.5, %v1420_v43  ;;  %v2892_v55 = vpop.permute.xlu1 %851  ;;  %v2219_v30 = vrot.slane %v2861_v54, %v2975_v29 }
 0x3f7   :  { %v816_v35 = vmul.f32 %v2820_v56, %v661_v33  ;;  %v1566_v36 = vpop.f32.mrb[8].mxu1  ;;  %v2895_v56 = vsub.s32 0, %v2658_v63 }
 0x3f8   :  { %v817_v37 = vsel %vm3156_vm3, %v815_v32, 0.0  ;;  %v2445_v38 = vpop.f32.mrb[9].mxu1  ;;  %2553 = vtanh.f32 %v1423_v48  ;;  %v1567_v14 = vadd.f32 %v1566_v36, %v2676_v24  ;;  %v2229_v32 = vrot.slane %v2219_v30, %v2975_v29 }
 0x3f9   :  { %v818_v39 = vrot.slane %v817_v37, 4  ;;  %v824_v40 = vsel %vm3157_vm4, %v816_v35, 0.0  ;;  %vm874_vm4 = vcmask 187392   ;;  %v2165_v57 = vrot.slane %v2867_v8, %v2895_v56 }
 0x3fa   :  { %v825_v41 = vrot.slane %v824_v40, 4  ;;  %v2905_v7 = vpop.permute.xlu1 %856  ;;  %v1570_v19 = vmax.f32 %v1567_v14, 0.0  ;;  %v2233_v8 = vrot.slane %v2878_v25, %v2975_v29  ;;  %v2992_v38 = vsub.s32 1, %v2658_v63 }
 0x3fb   :  { %v819_v44 = vadd.f32 %v818_v39, %v817_v37  ;;  %v2989_v37 = vsub.s32 3, %v2658_v63  ;;  %v1097_v39 = vsub.s32 5, %v2658_v63 }
 0x3fc   :  { %v826_v0 = vadd.f32 %v825_v41, %v824_v40  ;;  %v1181_v40 = vsub.s32 7, %v2658_v63  ;;  %v2185_v25 = vrot.slane %v2861_v54, %v2992_v38 }
 0x3fd   :  { %v820_v46 = vrot.slane %v819_v44, 2  ;;  %v2253_v41 = vrot.slane %v2861_v54, %v2989_v37  ;;  %v2189_v43 = vrot.slane %v2861_v54, %v1097_v39 }
 0x3fe   :  { %v827_v47 = vrot.slane %v826_v0, 2  ;;  %v2923_v12 = vpop.permute.xlu1 %872 }
 0x3ff   :  { %v821_v49 = vadd.f32 %v820_v46, %v819_v44  ;;  %v2257_v44 = vrot.slane %v2861_v54, %v1181_v40 }
 0x400   :  { %v828_v50 = vadd.f32 %v827_v47, %v826_v0  ;;  %v2263_v0 = vrot.slane %v2253_v41, %v2989_v37 }
 0x401   :  { %v822_v51 = vrot.slane %v821_v49, 1  ;;  %v2267_v47 = vrot.slane %v2257_v44, %v2989_v37 }
 0x402   :  { %v829_v61 = vrot.slane %v828_v50, 1  ;;  %v2554_v10 = vpop.eup %2553  ;;  %v2935_v15 = vpop.permute.xlu1 %956 }
 0x403   :  { %v823_v53 = vadd.f32 %v822_v51, %v821_v49  ;;  %v1425_v5 = vmul.f32 0.5, %v2554_v10  ;;  %v2195_v49 = vrot.slane %v2185_v25, %v2992_v38 }
 0x404   :  { %v830_v60 = vadd.f32 %v829_v61, %v828_v50  ;;  %v2199_v50 = vrot.slane %v2189_v43, %v2992_v38  ;;  %v1089_v61 = vpop.permute.xlu0 %1088 }
 0x405   :  { %v835_v62 = vadd.f32 %v2890_v52, %v823_v53  ;;  %v1426_v13 = vadd.f32 0.5, %v1425_v5  ;;  %v3014_v53 = vmul.f32 %v2195_v49, %v1089_v61 }
 0x406   :  { %v836_v2 = vadd.f32 %v2890_v52, %v830_v60  ;;  %v2963_v21 = vpop.permute.xlu1 %1035  ;;  %v3016_v60 = vmul.f32 %v2199_v50, %v1089_v61 }
 0x407   :  { %v2900_v3 = vrot.slane %v835_v62, %v2895_v56  ;;  %v1800_v18 = vpack.c.bf16 %v1426_v13, %v1426_v13  ;;  %v1031_v62 = vld [vmem:[%s3142_s1] sm:$0xff] }
 0x408   :  { %v2903_v4 = vrot.slane %v836_v2, %v2895_v56  ;;  %v1052_v2 = vrot.slane %v1031_v62, %v2895_v56  ;;  %v1056_v10 = vrot.slane %v1031_v62, %v1055_v16  ;;  %v1140_v16 = vrot.slane %v1031_v62, %v1139_v23 }
 0x409   :  { %vm859_vm6 = vcmp.gt.f32.partialorder %v2900_v3, %v2888_v42  ;;  %vm861_vm7 = vcmp.gt.f32.partialorder %v2900_v3, %v2892_v55  ;;  %vm863_vm3 = vcmp.gt.f32.partialorder %v2900_v3, %v2905_v7  ;;  %v1801_v20 = vunpack.c.l.bf16 %v1800_v18 }
 0x40a   :  { %vm860_vm10 = vcmp.gt.f32.partialorder %v2903_v4, %v2888_v42  ;;  %vm862_vm11 = vcmp.gt.f32.partialorder %v2903_v4, %v2892_v55  ;;  %vm864_vm12 = vcmp.gt.f32.partialorder %v2903_v4, %v2905_v7  ;;  %vm2469_vm9 = vmpackc.low %vm861_vm7, %vm859_vm6  ;;  %v869_v6 = vsel %vm863_vm3, 1.0, %v2557_v1  ;;  %v1047_v26 = vpop.permute.xlu1 %1046 }
 0x40b   :  { %vm2467_vm13 = vmpackc.low %vm862_vm11, %vm860_vm10  ;;  %v870_v11 = vsel %vm864_vm12, 1.0, %v2557_v1  ;;  %vm3158_vm6 = vcmask 39936   ;;  %v1802_v24 = vsub.f32 %v1426_v13, %v1801_v20  ;;  %v2970_v28 = vmul.f32 %v2165_v57, %v1047_v26 }
 0x40c   :  { %2468 = vmatprep.subr.msk.bf16.mxu0 %vm2467_vm13, %v2564_v59  ;;  %v1094_v13 = vrot.slane %v1031_v62, %v2992_v38  ;;  %v1041_v18 = vcombine.high %v1031_v62, %v1031_v62  ;;  %v1150_v23 = vrot.slane %v1140_v16, %v2975_v29  ;;  %v1178_v49 = vrot.slane %v1031_v62, %v2989_v37 }
 0x40d   :  { %2470 = vmatpush1.bf16.msk.msra.mxu0 %vm2469_vm9, %v2564_v59 }
 0x40e   :  { %2334 = vmatprep.subr.msk.mxu0 %vm877_vm2, %v870_v11  ;;  %v2972_v58 = vpop.permute.xlu1 %1072 }
 0x411   :  { %2335 = vmatpush1.msk.msra.mxu0 %vm877_vm2, %v869_v6 }
 0x412   :  { %2336 = vmatmul.mubr.msk.f32.vlgmr.msra.gmra.mrb[8].mxu0 %vm874_vm4, %v2923_v12  ;;  %2472 = vmatprep.subr.msk.bf16.mxu0 %vm2467_vm13, %v2564_v59  ;;  %v2979_v31 = vpop.permute.xlu1 %1114 }
 0x413   :  { %2474 = vmatpush1.bf16.msk.msra.mxu0 %vm2469_vm9, %v2564_v59  ;;  %1024 = vmatprep.mubr.f32.mxu0 %v2557_v1 }
 0x414   :  { %2341 = vmatprep.subr.msk.mxu0 %vm877_vm2, %v870_v11 }
 0x416   :  { %v1131_v33 = vpop.permute.xlu1 %1130 }
 0x417   :  { %2342 = vmatpush1.msk.msra.mxu0 %vm877_vm2, %v869_v6  ;;  %v2984_v35 = vmul.f32 %v2229_v32, %v1131_v33  ;;  %v2986_v36 = vmul.f32 %v2233_v8, %v1131_v33  ;;  %v1104_v32 = vrot.slane %v1094_v13, %v2992_v38 }
 0x418   :  { %2446 = vmatprep.subr.mxu0 %v2557_v1 }
 0x41a   :  { %2343 = vmatmul.mubr.msk.f32.vlgmr.msra.gmra.mrb[8].mxu0 %vm874_vm4, %v2935_v15  ;;  %v3003_v46 = vpop.permute.xlu1 %1172 }
 0x41b   :  { %2447 = vmatpush3.msk.msra.mxu0 %vm207_vm8, %v1570_v19  ;;  %2448 = vmatprep.mubr.msk.f32.mxu0 %vm2558_vm1, %v2557_v1  ;;  %v3007_v48 = vmul.f32 %v2263_v0, %v3003_v46  ;;  %v3012_v51 = vmul.f32 %v2267_v47, %v3003_v46  ;;  %v1098_v19 = vrot.slane %v1031_v62, %v1097_v39  ;;  %vm3159_vm1 = vcmask 1043456  }
 0x41c   :  { %2484 = vmatprep.subr.msk.bf16.mxu0 %vm2742_vm14, %v2564_v59  ;;  %vm3160_vm8 = vmmov %vm3159_vm1 }
 0x41d   :  { %v1108_v41 = vrot.slane %v1098_v19, %v2992_v38  ;;  %v1188_v19 = vrot.slane %v1178_v49, %v2989_v37 }
 0x41e   :  { %2449 = vmatmul.mubr.msk.f32.vlgmr.msra.gmra.mrb[10].mxu0 %vm3158_vm6, %v2684_v34  ;;  %v2151_v34 = vrot.slane %v2861_v54, %v2895_v56 }
 0x41f   :  { %2486 = vmatpush1.bf16.msk.msra.mxu0 %vm2746_vm15, %v2564_v59  ;;  %1870 = vmatprep.mubr.f32.mxu0 %v2557_v1 }
 0x420   :  { %2488 = vmatprep.subr.msk.bf16.mxu0 %vm2742_vm14, %v2564_v59  ;;  %v2161_v22 = vrot.slane %v2151_v34, %v2895_v56 }
 0x422   :  { %2374 = vmatmul.mubr.msk.f32.vlgmr.msra.gmra.mrb[12].mxu0 %vm62_vm0, %v1802_v24  ;;  %v2968_v27 = vmul.f32 %v2161_v22, %v1047_v26  ;;  %v1136_v24 = vrot.slane %v1031_v62, %v2975_v29  ;;  %v1066_v22 = vrot.slane %v1056_v10, %v2895_v56 }
 0x423   :  { %2490 = vmatpush1.bf16.msk.msra.mxu0 %vm2746_vm15, %v2564_v59  ;;  %1944 = vmatprep.mubr.f32.mxu0 %v2557_v1 }
 0x424   :  { %v1146_v43 = vrot.slane %v1136_v24, %v2975_v29  ;;  %v1068_v63 = vmul.f32 %v1066_v22, %v1047_v26 }
 0x42a   :  { %2379 = vmatmul.mubr.msk.f32.vlgmr.msra.gmra.mrb[12].mxu0 %vm62_vm0, %v1801_v20  ;;  %v1062_v20 = vrot.slane %v1052_v2, %v2895_v56  ;;  %v1109_v2 = vmul.f32 %v1104_v32, %v1089_v61  ;;  %v1193_v32 = vmul.f32 %v1188_v19, %v3003_v46 }
 0x42c   :  { %v1067_v25 = vmul.f32 %v1062_v20, %v1047_v26  ;;  %v1151_v26 = vmul.f32 %v1146_v43, %v1131_v33 }
 0x4ed   :  { %v1026_v11 = vpop.f32.mrb[8].mxu0 }
 0x4ee   :  { %v1032_v5 = vmul.f32 %v1026_v11, %v2900_v3  ;;  %v1028_v6 = vpop.f32.mrb[9].mxu0  ;;  %v1182_v11 = vrot.slane %v1031_v62, %v1181_v40  ;;  %v3051_v40 = vpop.permute.xlu0 %1156 }
 0x4ef   :  { %v1033_v14 = vmul.f32 %v1028_v6, %v2903_v4  ;;  %v1110_v6 = vmul.f32 %v1108_v41, %v1089_v61 }
 0x4f0   :  { %v1038_v34 = vadd.f32 %v2963_v21, %v1032_v5  ;;  %v1192_v22 = vrot.slane %v1182_v11, %v2989_v37 }
 0x4f1   :  { %v1039_v3 = vadd.f32 %v2963_v21, %v1033_v14  ;;  %v1640_v57 = vpop.f32.mrb[10].mxu0  ;;  %v1152_v14 = vmul.f32 %v1150_v23, %v1131_v33 }
 0x4f2   :  { %v1043_v30 = vmul.f32 %v1038_v34, %v1031_v62  ;;  %v1641_v4 = vadd.f32 %v1640_v57, %v2737_v45  ;;  %v2450_v8 = vpop.f32.mrb[11].mxu0  ;;  %v1194_v43 = vmul.f32 %v1192_v22, %v3003_v46 }
 0x4f3   :  { %v1044_v39 = vmul.f32 %v1041_v18, %v1039_v3 }
 0x4f4   :  { %v1078_v44 = vrot.slane %v1043_v30, %v2895_v56  ;;  %v1644_v0 = vmul.f32 0.5, %v1641_v4  ;;  %v1120_v50 = vrot.slane %v1043_v30, %v2992_v38  ;;  %v1162_v34 = vrot.slane %v1043_v30, %v2975_v29 }
 0x4f5   :  { %v1082_v47 = vrot.slane %v1044_v39, %v2895_v56  ;;  %v1124_v10 = vrot.slane %v1044_v39, %v2992_v38  ;;  %v1166_v61 = vrot.slane %v1044_v39, %v2975_v29  ;;  %v1204_v4 = vrot.slane %v1043_v30, %v2989_v37 }
 0x4f6   :  { %v1083_v45 = vmul.f32 %v1078_v44, %v2972_v58  ;;  %2555 = vtanh.f32 %v1644_v0  ;;  %v1125_v24 = vmul.f32 %v1120_v50, %v2979_v31  ;;  %v1167_v41 = vmul.f32 %v1162_v34, %v3051_v40  ;;  %v3058_v44 = vpop.permute.xlu1 %1198 }
 0x4f7   :  { %v1084_v5 = vmul.f32 %v1082_v47, %v2972_v58  ;;  %v1126_v3 = vmul.f32 %v1124_v10, %v2979_v31  ;;  %v1208_v0 = vrot.slane %v1044_v39, %v2989_v37  ;;  %v1168_v23 = vmul.f32 %v1166_v61, %v3051_v40 }
 0x4f8   :  { %v1085_v13 = vadd.f32 %v1083_v45, %v1067_v25 }
 0x4f9   :  { %v1086_v18 = vadd.f32 %v1084_v5, %v1068_v63  ;;  %v1210_v11 = vmul.f32 %v1208_v0, %v3058_v44  ;;  %v3064_v5 = vpop.permute.xlu0 %1214 }
 0x4fa   :  { %v1111_v20 = vadd.f32 %v1109_v2, %v1085_v13  ;;  %v1209_v2 = vmul.f32 %v1204_v4, %v3058_v44 }
 0x4fb   :  { %v1112_v16 = vadd.f32 %v1110_v6, %v1086_v18 }
 0x4fc   :  { %v1127_v62 = vadd.f32 %v1125_v24, %v1111_v20 }
 0x4fd   :  { %v1128_v57 = vadd.f32 %v1126_v3, %v1112_v16  ;;  %v1946_v33 = vpop.f32.mrb[12].mxu0 }
 0x4fe   :  { %v1153_v8 = vadd.f32 %v1151_v26, %v1127_v62  ;;  %v1948_v25 = vpop.f32.mrb[13].mxu0 }
 0x4ff   :  { %v1154_v63 = vadd.f32 %v1152_v14, %v1128_v57 }
 0x500   :  { %v2556_v47 = vpop.eup %2555  ;;  %v1169_v49 = vadd.f32 %v1167_v41, %v1153_v8 }
 0x501   :  { %v1646_v50 = vmul.f32 0.5, %v2556_v47  ;;  %v1170_v45 = vadd.f32 %v1168_v23, %v1154_v63 }
 0x502   :  { %v1195_v30 = vadd.f32 %v1193_v32, %v1169_v49 }
 0x503   :  { %v1647_v10 = vadd.f32 0.5, %v1646_v50  ;;  %v1196_v46 = vadd.f32 %v1194_v43, %v1170_v45 }
 0x504   :  { %v1211_v6 = vadd.f32 %v1209_v2, %v1195_v30 }
 0x505   :  { %v1648_v13 = vmul.f32 %v1647_v10, %v2806_v17  ;;  %v1212_v39 = vadd.f32 %v1210_v11, %v1196_v46 }
 0x506   :  { %v1217_v26 = vadd.f32 %v3064_v5, %v1211_v6 }
 0x507   :  { %v1649_v14 = vpack.c.bf16 %v1648_v13, %v1648_v13  ;;  %v1218_v18 = vadd.f32 %v3064_v5, %v1212_v39 }
 0x508   :  { %v1219_v19 = vmax.f32 %v1217_v26, 0.0 }
 0x509   :  { %v1650_v20 = vunpack.c.l.bf16 %v1649_v14  ;;  %v1220_v24 = vmax.f32 %v1218_v18, 0.0 }
 0x50b   :  { %v1651_v34 = vsub.f32 %v1648_v13, %v1650_v20  ;;  %v2292_v22 = vcombine.low %v1219_v19, %v1220_v24 }
 0x50d   :  { %2296 = vst [vmem:[%s3143_s3] sm:$0xff] %v2292_v22  ;;  %2364 = vmatmul.mubr.msk.f32.vlgmr.msra.gmra.mrb[10].mxu1 %vm62_vm0, %v1651_v34 }
 0x50e   :  { %2482 = vmatpush1.bf16.msk.msra.mxu1 %vm2785_vm5, %v2564_v59  ;;  %1793 = vmatprep.mubr.f32.mxu1 %v2557_v1 }
 0x515   :  { %2369 = vmatmul.mubr.msk.f32.vlgmr.msra.gmra.mrb[10].mxu1 %vm62_vm0, %v1650_v20 }
 0x516   :  { %2059 = vmatprep.mubr.f32.mxu1 %v2557_v1 }
 0x5e8   :  { %v1795_v17 = vpop.f32.mrb[10].mxu1 }
 0x5e9   :  { %v1951_v16 = vmul.f32 %v1946_v33, %v1795_v17  ;;  %v1797_v3 = vpop.f32.mrb[11].mxu1 }
 0x5ea   :  { %v1952_v61 = vmul.f32 %v1948_v25, %v1797_v3 }
 0x5eb   :  { %v1953_v62 = vsel %vm3159_vm1, %v1951_v16, 0.0 }
 0x5ec   :  { %v1954_v57 = vrot.slane %v1953_v62, 4  ;;  %v1960_v32 = vsel %vm3160_vm8, %v1952_v61, 0.0 }
 0x5ed   :  { %v1961_v4 = vrot.slane %v1960_v32, 4 }
 0x5ee   :  { %v1955_v8 = vadd.f32 %v1954_v57, %v1953_v62 }
 0x5ef   :  { %v1962_v41 = vadd.f32 %v1961_v4, %v1960_v32 }
 0x5f0   :  { %v1956_v9 = vrot.slane %v1955_v8, 2 }
 0x5f1   :  { %v1963_v43 = vrot.slane %v1962_v41, 2 }
 0x5f2   :  { %v1957_v0 = vadd.f32 %v1956_v9, %v1955_v8 }
 0x5f3   :  { %v1964_v63 = vadd.f32 %v1963_v43, %v1962_v41 }
 0x5f4   :  { %v1958_v23 = vrot.slane %v1957_v0, 1 }
 0x5f5   :  { %v1965_v47 = vrot.slane %v1964_v63, 1 }
 0x5f6   :  { %v1959_v49 = vadd.f32 %v1958_v23, %v1957_v0 }
 0x5f7   :  { %v1966_v50 = vadd.f32 %v1965_v47, %v1964_v63 }
 0x5f8   :  { %v1967_v33 = vadd.f32 %v1959_v49, %v2890_v52 }
 0x5f9   :  { %v1968_v25 = vadd.f32 %v1966_v50, %v2890_v52 }
 0x5fa   :  { %v1972_v45 = vrot.slane %v1967_v33, %v2895_v56 }
 0x5fb   :  { %v1976_v2 = vrot.slane %v1968_v25, %v2895_v56 }
 0x5fc   :  { %vm1977_vm0 = vcmp.gt.f32.partialorder %v1972_v45, %v2888_v42  ;;  %vm1979_vm5 = vcmp.gt.f32.partialorder %v1972_v45, %v2892_v55  ;;  %vm1981_vm12 = vcmp.gt.f32.partialorder %v1972_v45, %v2905_v7 }
 0x5fd   :  { %vm1978_vm14 = vcmp.gt.f32.partialorder %v1976_v2, %v2888_v42  ;;  %vm1980_vm15 = vcmp.gt.f32.partialorder %v1976_v2, %v2892_v55  ;;  %vm1982_vm7 = vcmp.gt.f32.partialorder %v1976_v2, %v2905_v7  ;;  %vm2493_vm11 = vmpackc.low %vm1979_vm5, %vm1977_vm0  ;;  %v1987_v30 = vsel %vm1981_vm12, 1.0, %v2557_v1 }
 0x5fe   :  { %vm2491_vm10 = vmpackc.low %vm1980_vm15, %vm1978_vm14  ;;  %v1988_v52 = vsel %vm1982_vm7, 1.0, %v2557_v1 }
 0x5ff   :  { %2492 = vmatprep.subr.msk.bf16.mxu1 %vm2491_vm10, %v2564_v59 }
 0x600   :  { %2494 = vmatpush1.bf16.msk.msra.mxu1 %vm2493_vm11, %v2564_v59 }
 0x601   :  { %2384 = vmatprep.subr.msk.mxu1 %vm877_vm2, %v1988_v52 }
 0x604   :  { %2385 = vmatpush1.msk.msra.mxu1 %vm877_vm2, %v1987_v30 }
 0x605   :  { %2386 = vmatmul.mubr.msk.f32.vlgmr.msra.gmra.mrb[12].mxu1 %vm874_vm4, %v2923_v12  ;;  %2496 = vmatprep.subr.msk.bf16.mxu1 %vm2491_vm10, %v2564_v59  ;;  %v2144_v12 = vcombine.high %v2861_v54, %v2861_v54 }
 0x606   :  { %2498 = vmatpush1.bf16.msk.msra.mxu1 %vm2493_vm11, %v2564_v59  ;;  %2130 = vmatprep.mubr.f32.mxu1 %v2557_v1 }
 0x607   :  { %2391 = vmatprep.subr.msk.mxu1 %vm877_vm2, %v1988_v52 }
 0x60a   :  { %2392 = vmatpush1.msk.msra.mxu1 %vm877_vm2, %v1987_v30 }
 0x60d   :  { %2393 = vmatmul.mubr.msk.f32.vlgmr.msra.gmra.mrb[12].mxu1 %vm874_vm4, %v2935_v15 }
 0x6e0   :  { %v2132_v42 = vpop.f32.mrb[12].mxu1 }
 0x6e1   :  { %v2139_v55 = vmul.f32 %v2132_v42, %v1972_v45  ;;  %v2134_v7 = vpop.f32.mrb[13].mxu1 }
 0x6e2   :  { %v2140_v10 = vmul.f32 %v2134_v7, %v1976_v2 }
 0x6e3   :  { %v2141_v11 = vadd.f32 %v2139_v55, %v2963_v21 }
 0x6e4   :  { %v2142_v59 = vadd.f32 %v2140_v10, %v2963_v21 }
 0x6e5   :  { %v2146_v1 = vmul.f32 %v2861_v54, %v2141_v11 }
 0x6e6   :  { %v2147_v46 = vmul.f32 %v2144_v12, %v2142_v59 }
 0x6e7   :  { %v2173_v6 = vrot.slane %v2146_v1, %v2895_v56  ;;  %v2207_v39 = vrot.slane %v2146_v1, %v2992_v38  ;;  %v2241_v20 = vrot.slane %v2146_v1, %v2975_v29 }
 0x6e8   :  { %v2177_v13 = vrot.slane %v2147_v46, %v2895_v56  ;;  %v2211_v14 = vrot.slane %v2147_v46, %v2992_v38  ;;  %v2245_v34 = vrot.slane %v2147_v46, %v2975_v29  ;;  %v2279_v16 = vrot.slane %v2147_v46, %v2989_v37 }
 0x6e9   :  { %v2178_v15 = vmul.f32 %v2173_v6, %v2972_v58  ;;  %v2212_v54 = vmul.f32 %v2207_v39, %v2979_v31 }
 0x6ea   :  { %v2179_v26 = vmul.f32 %v2177_v13, %v2972_v58  ;;  %v2213_v24 = vmul.f32 %v2211_v14, %v2979_v31  ;;  %v2247_v17 = vmul.f32 %v2245_v34, %v3051_v40 }
 0x6eb   :  { %v2180_v18 = vadd.f32 %v2178_v15, %v2968_v27  ;;  %v2246_v27 = vmul.f32 %v2241_v20, %v3051_v40 }
 0x6ec   :  { %v2181_v19 = vadd.f32 %v2179_v26, %v2970_v28  ;;  %v2275_v28 = vrot.slane %v2146_v1, %v2989_v37 }
 0x6ed   :  { %v2202_v21 = vadd.f32 %v3014_v53, %v2180_v18 }
 0x6ee   :  { %v2203_v56 = vadd.f32 %v3016_v60, %v2181_v19  ;;  %v2280_v29 = vmul.f32 %v2275_v28, %v3058_v44 }
 0x6ef   :  { %v2214_v22 = vadd.f32 %v2212_v54, %v2202_v21 }
 0x6f0   :  { %v2215_v58 = vadd.f32 %v2213_v24, %v2203_v56 }
 0x6f1   :  { %v2236_v38 = vadd.f32 %v2984_v35, %v2214_v22  ;;  %v2281_v35 = vmul.f32 %v2279_v16, %v3058_v44 }
 0x6f2   :  { %v2237_v53 = vadd.f32 %v2986_v36, %v2215_v58 }
 0x6f3   :  { %v2248_v3 = vadd.f32 %v2246_v27, %v2236_v38 }
 0x6f4   :  { %v2249_v60 = vadd.f32 %v2247_v17, %v2237_v53 }
 0x6f5   :  { %v2270_v31 = vadd.f32 %v3007_v48, %v2248_v3 }
 0x6f6   :  { %v2271_v61 = vadd.f32 %v3012_v51, %v2249_v60 }
 0x6f7   :  { %v2282_v62 = vadd.f32 %v2280_v29, %v2270_v31 }
 0x6f8   :  { %v2283_v57 = vadd.f32 %v2281_v35, %v2271_v61 }
 0x6f9   :  { %v2284_v32 = vadd.f32 %v2282_v62, %v3064_v5 }
 0x6fa   :  { %v2285_v36 = vadd.f32 %v2283_v57, %v3064_v5 }
 0x6fb   :  { %v2286_v4 = vmax.f32 %v2284_v32, 0.0 }
 0x6fc   :  { %v2287_v40 = vmax.f32 %v2285_v36, 0.0 }
 0x6fe   :  { %v2293_v8 = vcombine.low %v2286_v4, %v2287_v40 }
 0x700   :  { %2297 = vst [vmem:[%s3143_s3 + $0x8] sm:$0xff] %v2293_v8 }

</bundles_post_ra>
